<compile_context>
chip_gen: v7x
topology: tpu7x:2x2x1
jax: 0.10.0
libtpu: 0.0.40
codegen_flags: <defaults>
</compile_context>

<pallas_src>
import functools

import jax
import jax.numpy as jnp
from jax import lax
from jax.experimental import pallas as pl
from jax.experimental.pallas import tpu as pltpu


# ---------------------------------------------------------------------------
# Kernel
# ---------------------------------------------------------------------------
def basic_conv1d_b_kernel(x_ref, m_ref, w1_ref, w2_ref, w3_ref, b_ref, o_ref,
                          *, use_xlu_roll, pool_in_kernel):
    """One grid step: B samples packed along the lane axis.

    x_ref : (1, C_in_p,  B*L)   f32, sample b occupies lanes [b*L, (b+1)*L)
    m_ref : (2, B*L)            f32 {0,1}: row0 = "lane is not first of sample",
                                row1 = "lane is not last of sample"
    wk_ref: (C_out_p, 3*C_prev_p)  BN-folded tap-major conv weights (bf16 or f32)
    b_ref : (3, C_out_p, 1)     f32 folded BN biases
    o_ref : (1, C_out_p, B*(L//2)) pooled output (or (1, C_out_p, B*L) when the
                                pool is done by the wrapper)
    """
    x = x_ref[0]                                   # (C_in_p, BL) f32
    BL = x.shape[-1]
    masks = m_ref[...]                             # (2, BL) f32
    not_first = masks[0:1, :]                      # (1, BL)
    not_last = masks[1:2, :]                       # (1, BL)

    def shift(h, amount):
        # np.roll semantics: result[:, l] = h[:, (l - amount) % BL]
        if use_xlu_roll:
            return pltpu.roll(h, shift=amount, axis=1)     # XLU slot
        return jnp.roll(h, amount, axis=1)                 # portable fallback

    def conv_bn_relu(h, w, b):
        # im2col along the sublane axis: [x[l-1]; x[l]; x[l+1]]  -> (3*C, BL).
        # Boundary lanes are zeroed per sample (== padding=1), via a 0/1 multiply.
        left = shift(h, 1) * not_first             # h[:, l-1]
        right = shift(h, BL - 1) * not_last        # h[:, l+1]   (non-negative shift)
        im2col = jnp.concatenate([left, h, right], axis=0)          # f32, 8-aligned
        # Single fused MXU matmul per layer (BN scale already folded into w).
        y = jnp.dot(w, im2col.astype(w.dtype), preferred_element_type=jnp.float32)
        return jnp.maximum(y + b, 0.0)

    h = conv_bn_relu(x, w1_ref[...], b_ref[0])
    h = conv_bn_relu(h, w2_ref[...], b_ref[1])
    h = conv_bn_relu(h, w3_ref[...], b_ref[2])

    if pool_in_kernel:
        # MaxPool1d(kernel=2, stride=2).  L is even, so pooling pairs never cross
        # sample boundaries inside the lane-packed slab.
        c = h.shape[0]
        o_ref[0] = jnp.max(h.reshape(c, BL // 2, 2), axis=-1)
    else:
        o_ref[0] = h


# ---------------------------------------------------------------------------
# Wrapper helpers
# ---------------------------------------------------------------------------
def _round_up(n, m):
    return ((n + m - 1) // m) * m


def _default_vmem_limit():
    # Raise the scoped VMEM limit (defaults: 16 MiB v5e, 32 MiB v6e/v7x) but stay
    # comfortably below physical VMEM (64 MiB/TC v7x, 128 MiB v5e/v6e).
    try:
        cap = int(pltpu.get_tpu_info().vmem_capacity_bytes)
    except Exception:
        cap = 64 << 20
    return max(32 << 20, min(cap * 3 // 4, 100 << 20))


def _pick_batch_block(N, L, c_max, vmem_budget_bytes):
    """Samples per grid step.

    Prefers (a) no lane-packing at all when L is already lane-dense (the
    wrapper's pack/unpack transposes become no-ops), (b) output lane widths that
    are multiples of 128, (c) the largest block fitting the VMEM budget, and
    (d) >= 2 grid steps when that does not shrink the block too much (v7x
    megacore)."""
    Lh = max(L // 2, 1)
    if Lh % 128 == 0 and L >= 512:
        return 1
    # Rough per-sample footprint: double-buffered in/out + f32 transients
    # (left/right/h/im2col/bf16 copy) ~ 10 * c_max * L f32 words.
    per_sample = 40 * c_max * L
    divisors = [d for d in range(1, N + 1) if N % d == 0]
    fits = [d for d in divisors if d * per_sample <= vmem_budget_bytes] or [1]
    lane_ok = [d for d in fits if (d * Lh) % 128 == 0]
    cands = lane_ok or fits
    best = max(cands)
    two_step = [d for d in cands if N // d >= 2 and d * Lh >= 1024]
    if two_step:
        best = max(two_step)
    return best


def fold_bn_into_conv(w, gamma, beta, mean, var, *, eps=1e-5,
                      c_in_pad=None, c_out_pad=None, dtype=jnp.bfloat16):
    """Fold inference BN into the conv weight; zero-pad channels; flatten tap-major.

    Returns (fused_w, bias): fused_w (C_out_pad, 3*C_in_pad) with
    fused_w[o, k*C_in_pad + i] = w[o, i, k] * scale[o]; bias (C_out_pad,) f32.
    Padded rows/cols are zero, so padded channels stay exactly 0 through ReLU.
    """
    c_out, c_in, k = w.shape
    assert k == 3
    if c_in_pad is None:
        c_in_pad = c_in
    if c_out_pad is None:
        c_out_pad = c_out
    scale = gamma / jnp.sqrt(var + eps)
    bias = beta - mean * scale
    wf = w * scale[:, None, None]                                   # (C_out, C_in, 3)
    wf = jnp.pad(wf, ((0, c_out_pad - c_out), (0, c_in_pad - c_in), (0, 0)))
    bias = jnp.pad(bias, (0, c_out_pad - c_out))
    wfl = jnp.transpose(wf, (0, 2, 1)).reshape(c_out_pad, 3 * c_in_pad)
    return wfl.astype(dtype), bias.astype(jnp.float32)


# ---------------------------------------------------------------------------
# Wrapper
# ---------------------------------------------------------------------------
def basic_conv1d_b(x, w1f, w2f, w3f, biases, c_out, *, batch_block=None,
                   use_xlu_roll=True, pool_in_kernel=True, vmem_limit_bytes=None):
    """x: (N, C_in, L) f32 -> (N, c_out, L//2) f32.

    w1f/w2f/w3f: BN-folded, channel-padded, tap-major weights (C_out_p, 3*C_prev_p).
    biases     : (3, C_out_p, 1) folded BN biases (f32).
    c_out      : unpadded number of output channels (final slice).
    """
    N, C_in, L = x.shape
    C_in_p = w1f.shape[1] // 3
    C_out_p = w1f.shape[0]
    assert L % 2 == 0, "MaxPool1d(2,2): even L assumed (PyTorch floors odd L)"
    Lh = L // 2

    if C_in_p > C_in:
        x = jnp.pad(x, ((0, 0), (0, C_in_p - C_in), (0, 0)))

    if vmem_limit_bytes is None:
        vmem_limit_bytes = _default_vmem_limit()

    B = batch_block if batch_block is not None else _pick_batch_block(
        N, L, max(C_in_p, C_out_p), vmem_limit_bytes // 2)
    assert N % B == 0
    G = N // B

    # Pack B samples along the lane axis: (G, C_in_p, B*L).  When B == 1 the
    # reshapes/transposes below are no-ops (no extra HBM traffic).
    x_r = x.reshape(G, B, C_in_p, L).transpose(0, 2, 1, 3).reshape(G, C_in_p, B * L)

    # Per-sample boundary masks, computed once outside the kernel.
    pos = jnp.arange(B * L, dtype=jnp.int32) % L
    masks = jnp.stack([(pos != 0).astype(jnp.float32),
                       (pos != L - 1).astype(jnp.float32)], axis=0)   # (2, B*L)

    out_lanes = B * Lh if pool_in_kernel else B * L
    kernel = functools.partial(basic_conv1d_b_kernel,
                               use_xlu_roll=use_xlu_roll,
                               pool_in_kernel=pool_in_kernel)

    out_r = pl.pallas_call(
        kernel,
        out_shape=jax.ShapeDtypeStruct((G, C_out_p, out_lanes), jnp.float32),
        grid_spec=pltpu.PrefetchScalarGridSpec(
            num_scalar_prefetch=0,
            grid=(G,),
            in_specs=[
                pl.BlockSpec((1, C_in_p, B * L), lambda g: (g, 0, 0)),
                pl.BlockSpec(masks.shape, lambda g: (0, 0)),
                pl.BlockSpec(w1f.shape, lambda g: (0, 0)),
                pl.BlockSpec(w2f.shape, lambda g: (0, 0)),
                pl.BlockSpec(w3f.shape, lambda g: (0, 0)),
                pl.BlockSpec(biases.shape, lambda g: (0, 0, 0)),
            ],
            out_specs=pl.BlockSpec((1, C_out_p, out_lanes), lambda g: (g, 0, 0)),
        ),
        compiler_params=pltpu.CompilerParams(
            dimension_semantics=("parallel",),
            vmem_limit_bytes=int(vmem_limit_bytes)),
    )(x_r, masks, w1f, w2f, w3f, biases)

    if pool_in_kernel:
        out = out_r.reshape(G, C_out_p, B, Lh).transpose(0, 2, 1, 3).reshape(N, C_out_p, Lh)
    else:
        full = out_r.reshape(G, C_out_p, B, L).transpose(0, 2, 1, 3).reshape(N, C_out_p, L)
        out = jnp.max(full.reshape(N, C_out_p, Lh, 2), axis=-1)
    return out[:, :c_out, :]


# Fast config first; each fallback trades a little performance for portability.
_FALLBACK_CONFIGS = (
    dict(use_xlu_roll=True, pool_in_kernel=True),
    dict(use_xlu_roll=False, pool_in_kernel=True),
    dict(use_xlu_roll=False, pool_in_kernel=False),
)


# ---------------------------------------------------------------------------
# Plain-JAX reference (lax.conv) for correctness checks
# ---------------------------------------------------------------------------
def _reference(x, weights, bns, eps=1e-5):
    h = x
    for w, (gamma, beta, mean, var) in zip(weights, bns):
        h = lax.conv_general_dilated(
            h, w, window_strides=(1,), padding=((1, 1),),
            dimension_numbers=("NCH", "OIH", "NCH"))
        scale = gamma / jnp.sqrt(var + eps)
        h = h * scale[None, :, None] + (beta - mean * scale)[None, :, None]
        h = jnp.maximum(h, 0.0)
    N, C, L = h.shape
    return jnp.max(h.reshape(N, C, L // 2, 2), axis=-1)


def _run_with_fallback(x, w1f, w2f, w3f, biases, c_out, ref, atol, rtol):
    last_err = None
    for cfg in _FALLBACK_CONFIGS:
        try:
            out = jax.block_until_ready(
                basic_conv1d_b(x, w1f, w2f, w3f, biases, c_out, **cfg))
            if out.shape == ref.shape and bool(
                    jnp.allclose(out, ref, atol=atol, rtol=rtol)):
                return out, cfg
            last_err = AssertionError(f"config {cfg}: mismatch vs reference")
        except Exception as e:  # fall through to the next (more portable) config
            last_err = e
    raise last_err


# ---------------------------------------------------------------------------
# Self-test
# ---------------------------------------------------------------------------
if __name__ == "__main__":
    N, C_in, C_out, L = 2, 4, 8, 16

    key = jax.random.PRNGKey(0)
    keys = jax.random.split(key, 5)

    x = jax.random.normal(keys[0], (N, C_in, L), dtype=jnp.float32)

    # Deterministic synthetic parameters (not a checkpoint load).
    w1 = 0.2 * jax.random.normal(keys[1], (C_out, C_in, 3), dtype=jnp.float32)
    w2 = 0.2 * jax.random.normal(keys[2], (C_out, C_out, 3), dtype=jnp.float32)
    w3 = 0.2 * jax.random.normal(keys[3], (C_out, C_out, 3), dtype=jnp.float32)

    bn_keys = jax.random.split(keys[4], 12)

    def bn_params(kg, kb, km, kv):
        gamma = 1.0 + 0.1 * jax.random.normal(kg, (C_out,), dtype=jnp.float32)
        beta = 0.1 * jax.random.normal(kb, (C_out,), dtype=jnp.float32)
        mean = 0.1 * jax.random.normal(km, (C_out,), dtype=jnp.float32)
        var = jnp.abs(1.0 + 0.1 * jax.random.normal(kv, (C_out,), dtype=jnp.float32))
        return gamma, beta, mean, var

    bn1 = bn_params(*bn_keys[0:4])
    bn2 = bn_params(*bn_keys[4:8])
    bn3 = bn_params(*bn_keys[8:12])

    ref = jax.block_until_ready(_reference(x, (w1, w2, w3), (bn1, bn2, bn3)))

    c_in_p = _round_up(C_in, 8)
    c_out_p = _round_up(C_out, 8)

    def prepare(dtype):
        w1f, b1 = fold_bn_into_conv(w1, *bn1, c_in_pad=c_in_p, c_out_pad=c_out_p, dtype=dtype)
        w2f, b2 = fold_bn_into_conv(w2, *bn2, c_in_pad=c_out_p, c_out_pad=c_out_p, dtype=dtype)
        w3f, b3 = fold_bn_into_conv(w3, *bn3, c_in_pad=c_out_p, c_out_pad=c_out_p, dtype=dtype)
        biases = jnp.stack([b1, b2, b3], axis=0)[:, :, None]          # (3, C_out_p, 1)
        return w1f, w2f, w3f, biases

    # 1) f32 MXU operands: validates kernel logic tightly against lax.conv.
    out_f32, _ = _run_with_fallback(x, *prepare(jnp.float32), C_out, ref,
                                    atol=1e-4, rtol=1e-4)
    assert out_f32.shape == (N, C_out, L // 2), out_f32.shape

    # 2) bf16 MXU operands (the performance default): looser tolerance.
    out_bf16, _ = _run_with_fallback(x, *prepare(jnp.bfloat16), C_out, ref,
                                     atol=2e-2, rtol=2e-2)
    assert out_bf16.shape == (N, C_out, L // 2), out_bf16.shape

    print("KERNEL_OK")
</pallas_src>

<mosaic_0001>
module attributes {stable_mosaic.version = 11 : i64} {
  func.func @basic_conv1d_b_kernel(%arg0: i32, %arg1: memref<1x8x32xf32, #tpu.memory_space<vmem>>, %arg2: memref<2x32xf32, #tpu.memory_space<vmem>>, %arg3: memref<8x24xf32, #tpu.memory_space<vmem>>, %arg4: memref<8x24xf32, #tpu.memory_space<vmem>>, %arg5: memref<8x24xf32, #tpu.memory_space<vmem>>, %arg6: memref<3x8x1xf32, #tpu.memory_space<vmem>>, %arg7: memref<1x8x16xf32, #tpu.memory_space<vmem>>) attributes {dimension_semantics = [#tpu.dimension_semantics<parallel>], iteration_bounds = array<i64: 1>, scalar_prefetch = 0 : i64, scratch_operands = 0 : i64, tpu.core_type = #tpu.core_type<tc>, window_params = [{transform_indices = @transform_0, window_bounds = array<i64: 1, 8, 32>}, {pipeline_mode = #tpu.pipeline_mode<synchronous>, transform_indices = @transform_1, window_bounds = array<i64: 2, 32>}, {pipeline_mode = #tpu.pipeline_mode<synchronous>, transform_indices = @transform_2, window_bounds = array<i64: 8, 24>}, {pipeline_mode = #tpu.pipeline_mode<synchronous>, transform_indices = @transform_3, window_bounds = array<i64: 8, 24>}, {pipeline_mode = #tpu.pipeline_mode<synchronous>, transform_indices = @transform_4, window_bounds = array<i64: 8, 24>}, {pipeline_mode = #tpu.pipeline_mode<synchronous>, transform_indices = @transform_5, window_bounds = array<i64: 3, 8, 1>}, {transform_indices = @transform_6, window_bounds = array<i64: 1, 8, 16>}]} {
    %c0 = arith.constant 0 : index
    %c0_0 = arith.constant 0 : index
    %c0_1 = arith.constant 0 : index
    %0 = vector.load %arg1[%c0, %c0_0, %c0_1] : memref<1x8x32xf32, #tpu.memory_space<vmem>>, vector<1x8x32xf32>
    %1 = vector.shape_cast %0 : vector<1x8x32xf32> to vector<8x32xf32>
    %c0_2 = arith.constant 0 : index
    %c0_3 = arith.constant 0 : index
    %2 = vector.load %arg2[%c0_2, %c0_3] : memref<2x32xf32, #tpu.memory_space<vmem>>, vector<2x32xf32>
    %3 = vector.extract_strided_slice %2 {offsets = [0, 0], sizes = [1, 32], strides = [1, 1]} : vector<2x32xf32> to vector<1x32xf32>
    %4 = vector.extract_strided_slice %2 {offsets = [1, 0], sizes = [1, 32], strides = [1, 1]} : vector<2x32xf32> to vector<1x32xf32>
    %c0_4 = arith.constant 0 : index
    %c0_5 = arith.constant 0 : index
    %5 = vector.load %arg3[%c0_4, %c0_5] : memref<8x24xf32, #tpu.memory_space<vmem>>, vector<8x24xf32>
    %c0_6 = arith.constant 0 : index
    %c0_7 = arith.constant 0 : index
    %c0_8 = arith.constant 0 : index
    %6 = vector.load %arg6[%c0_6, %c0_7, %c0_8] : memref<3x8x1xf32, #tpu.memory_space<vmem>>, vector<1x8x1xf32>
    %7 = vector.shape_cast %6 : vector<1x8x1xf32> to vector<8x1xf32>
    %c1_i32 = arith.constant 1 : i32
    %8 = tpu.dynamic_rotate %1 by %c1_i32 dim 1 : vector<8x32xf32>, i32 -> vector<8x32xf32>
    %9 = vector.broadcast %3 : vector<1x32xf32> to vector<8x32xf32>
    %10 = arith.mulf %8, %9 : vector<8x32xf32>
    %c31_i32 = arith.constant 31 : i32
    %11 = tpu.dynamic_rotate %1 by %c31_i32 dim 1 : vector<8x32xf32>, i32 -> vector<8x32xf32>
    %12 = vector.broadcast %4 : vector<1x32xf32> to vector<8x32xf32>
    %13 = arith.mulf %11, %12 : vector<8x32xf32>
    %14 = tpu.concatenate %10, %1, %13 in 0 : vector<8x32xf32>, vector<8x32xf32>, vector<8x32xf32> -> vector<24x32xf32>
    %cst = arith.constant dense<0.000000e+00> : vector<8x32xf32>
    %15 = tpu.matmul %5, %14, %cst {dimension_numbers = #tpu.dot_dimension_numbers<[1], [0], [0], [1], [0, 0, 1, 1], [], []>} : vector<8x24xf32>, vector<24x32xf32>, vector<8x32xf32> -> vector<8x32xf32>
    %16 = vector.broadcast %7 : vector<8x1xf32> to vector<8x32xf32>
    %17 = arith.addf %15, %16 : vector<8x32xf32>
    %cst_9 = arith.constant 0.000000e+00 : f32
    %18 = vector.broadcast %cst_9 : f32 to vector<8x32xf32>
    %19 = arith.maximumf %17, %18 : vector<8x32xf32>
    %c0_10 = arith.constant 0 : index
    %c0_11 = arith.constant 0 : index
    %20 = vector.load %arg4[%c0_10, %c0_11] : memref<8x24xf32, #tpu.memory_space<vmem>>, vector<8x24xf32>
    %c1 = arith.constant 1 : index
    %c0_12 = arith.constant 0 : index
    %c0_13 = arith.constant 0 : index
    %21 = vector.load %arg6[%c1, %c0_12, %c0_13] : memref<3x8x1xf32, #tpu.memory_space<vmem>>, vector<1x8x1xf32>
    %22 = vector.shape_cast %21 : vector<1x8x1xf32> to vector<8x1xf32>
    %c1_i32_14 = arith.constant 1 : i32
    %23 = tpu.dynamic_rotate %19 by %c1_i32_14 dim 1 : vector<8x32xf32>, i32 -> vector<8x32xf32>
    %24 = vector.broadcast %3 : vector<1x32xf32> to vector<8x32xf32>
    %25 = arith.mulf %23, %24 : vector<8x32xf32>
    %c31_i32_15 = arith.constant 31 : i32
    %26 = tpu.dynamic_rotate %19 by %c31_i32_15 dim 1 : vector<8x32xf32>, i32 -> vector<8x32xf32>
    %27 = vector.broadcast %4 : vector<1x32xf32> to vector<8x32xf32>
    %28 = arith.mulf %26, %27 : vector<8x32xf32>
    %29 = tpu.concatenate %25, %19, %28 in 0 : vector<8x32xf32>, vector<8x32xf32>, vector<8x32xf32> -> vector<24x32xf32>
    %cst_16 = arith.constant dense<0.000000e+00> : vector<8x32xf32>
    %30 = tpu.matmul %20, %29, %cst_16 {dimension_numbers = #tpu.dot_dimension_numbers<[1], [0], [0], [1], [0, 0, 1, 1], [], []>} : vector<8x24xf32>, vector<24x32xf32>, vector<8x32xf32> -> vector<8x32xf32>
    %31 = vector.broadcast %22 : vector<8x1xf32> to vector<8x32xf32>
    %32 = arith.addf %30, %31 : vector<8x32xf32>
    %cst_17 = arith.constant 0.000000e+00 : f32
    %33 = vector.broadcast %cst_17 : f32 to vector<8x32xf32>
    %34 = arith.maximumf %32, %33 : vector<8x32xf32>
    %c0_18 = arith.constant 0 : index
    %c0_19 = arith.constant 0 : index
    %35 = vector.load %arg5[%c0_18, %c0_19] : memref<8x24xf32, #tpu.memory_space<vmem>>, vector<8x24xf32>
    %c2 = arith.constant 2 : index
    %c0_20 = arith.constant 0 : index
    %c0_21 = arith.constant 0 : index
    %36 = vector.load %arg6[%c2, %c0_20, %c0_21] : memref<3x8x1xf32, #tpu.memory_space<vmem>>, vector<1x8x1xf32>
    %37 = vector.shape_cast %36 : vector<1x8x1xf32> to vector<8x1xf32>
    %c1_i32_22 = arith.constant 1 : i32
    %38 = tpu.dynamic_rotate %34 by %c1_i32_22 dim 1 : vector<8x32xf32>, i32 -> vector<8x32xf32>
    %39 = vector.broadcast %3 : vector<1x32xf32> to vector<8x32xf32>
    %40 = arith.mulf %38, %39 : vector<8x32xf32>
    %c31_i32_23 = arith.constant 31 : i32
    %41 = tpu.dynamic_rotate %34 by %c31_i32_23 dim 1 : vector<8x32xf32>, i32 -> vector<8x32xf32>
    %42 = vector.broadcast %4 : vector<1x32xf32> to vector<8x32xf32>
    %43 = arith.mulf %41, %42 : vector<8x32xf32>
    %44 = tpu.concatenate %40, %34, %43 in 0 : vector<8x32xf32>, vector<8x32xf32>, vector<8x32xf32> -> vector<24x32xf32>
    %cst_24 = arith.constant dense<0.000000e+00> : vector<8x32xf32>
    %45 = tpu.matmul %35, %44, %cst_24 {dimension_numbers = #tpu.dot_dimension_numbers<[1], [0], [0], [1], [0, 0, 1, 1], [], []>} : vector<8x24xf32>, vector<24x32xf32>, vector<8x32xf32> -> vector<8x32xf32>
    %46 = vector.broadcast %37 : vector<8x1xf32> to vector<8x32xf32>
    %47 = arith.addf %45, %46 : vector<8x32xf32>
    %cst_25 = arith.constant 0.000000e+00 : f32
    %48 = vector.broadcast %cst_25 : f32 to vector<8x32xf32>
    %49 = arith.maximumf %47, %48 : vector<8x32xf32>
    %50 = vector.shape_cast %49 : vector<8x32xf32> to vector<8x16x2xf32>
    %cst_26 = arith.constant dense<0xFF800000> : vector<8x16xf32>
    %51 = vector.multi_reduction <maximumf>, %50, %cst_26 [2] : vector<8x16x2xf32> to vector<8x16xf32>
    %c0_27 = arith.constant 0 : index
    %c0_28 = arith.constant 0 : index
    %c0_29 = arith.constant 0 : index
    %52 = vector.load %arg7[%c0_27, %c0_28, %c0_29] : memref<1x8x16xf32, #tpu.memory_space<vmem>>, vector<1x8x16xf32>
    %53 = vector.shape_cast %52 : vector<1x8x16xf32> to vector<8x16xf32>
    %54 = vector.shape_cast %51 : vector<8x16xf32> to vector<1x8x16xf32>
    tpu.vector_store %arg7[%c0_27, %c0_28, %c0_29], %54 {strides = array<i32>} : memref<1x8x16xf32, #tpu.memory_space<vmem>>, vector<1x8x16xf32>,
    return
  }
  func.func @transform_0(%arg0: i32) -> (i32, i32, i32) {
    %c0_i32 = arith.constant 0 : i32
    %c0_i32_0 = arith.constant 0 : i32
    %c0_i32_1 = arith.constant 0 : i32
    return %arg0, %c0_i32, %c0_i32_0 : i32, i32, i32
  }
  func.func @transform_1(%arg0: i32) -> (i32, i32) {
    %c0_i32 = arith.constant 0 : i32
    %c0_i32_0 = arith.constant 0 : i32
    %c0_i32_1 = arith.constant 0 : i32
    return %c0_i32, %c0_i32_0 : i32, i32
  }
  func.func @transform_2(%arg0: i32) -> (i32, i32) {
    %c0_i32 = arith.constant 0 : i32
    %c0_i32_0 = arith.constant 0 : i32
    %c0_i32_1 = arith.constant 0 : i32
    return %c0_i32, %c0_i32_0 : i32, i32
  }
  func.func @transform_3(%arg0: i32) -> (i32, i32) {
    %c0_i32 = arith.constant 0 : i32
    %c0_i32_0 = arith.constant 0 : i32
    %c0_i32_1 = arith.constant 0 : i32
    return %c0_i32, %c0_i32_0 : i32, i32
  }
  func.func @transform_4(%arg0: i32) -> (i32, i32) {
    %c0_i32 = arith.constant 0 : i32
    %c0_i32_0 = arith.constant 0 : i32
    %c0_i32_1 = arith.constant 0 : i32
    return %c0_i32, %c0_i32_0 : i32, i32
  }
  func.func @transform_5(%arg0: i32) -> (i32, i32, i32) {
    %c0_i32 = arith.constant 0 : i32
    %c0_i32_0 = arith.constant 0 : i32
    %c0_i32_1 = arith.constant 0 : i32
    %c0_i32_2 = arith.constant 0 : i32
    return %c0_i32, %c0_i32_0, %c0_i32_1 : i32, i32, i32
  }
  func.func @transform_6(%arg0: i32) -> (i32, i32, i32) {
    %c0_i32 = arith.constant 0 : i32
    %c0_i32_0 = arith.constant 0 : i32
    %c0_i32_1 = arith.constant 0 : i32
    return %arg0, %c0_i32, %c0_i32_0 : i32, i32, i32
  }
}

module attributes {stable_mosaic.version = 11 : i64} {
  func.func @basic_conv1d_b_kernel(%arg0: i32, %arg1: memref<1x8x32xf32, #tpu.memory_space<vmem>>, %arg2: memref<2x32xf32, #tpu.memory_space<vmem>>, %arg3: memref<8x24xf32, #tpu.memory_space<vmem>>, %arg4: memref<8x24xf32, #tpu.memory_space<vmem>>, %arg5: memref<8x24xf32, #tpu.memory_space<vmem>>, %arg6: memref<3x8x1xf32, #tpu.memory_space<vmem>>, %arg7: memref<1x8x16xf32, #tpu.memory_space<vmem>>) attributes {dimension_semantics = [#tpu.dimension_semantics<parallel>], iteration_bounds = array<i64: 1>, scalar_prefetch = 0 : i64, scratch_operands = 0 : i64, tpu.core_type = #tpu.core_type<tc>, window_params = [{transform_indices = @transform_0, window_bounds = array<i64: 1, 8, 32>}, {pipeline_mode = #tpu.pipeline_mode<synchronous>, transform_indices = @transform_1, window_bounds = array<i64: 2, 32>}, {pipeline_mode = #tpu.pipeline_mode<synchronous>, transform_indices = @transform_2, window_bounds = array<i64: 8, 24>}, {pipeline_mode = #tpu.pipeline_mode<synchronous>, transform_indices = @transform_3, window_bounds = array<i64: 8, 24>}, {pipeline_mode = #tpu.pipeline_mode<synchronous>, transform_indices = @transform_4, window_bounds = array<i64: 8, 24>}, {pipeline_mode = #tpu.pipeline_mode<synchronous>, transform_indices = @transform_5, window_bounds = array<i64: 3, 8, 1>}, {transform_indices = @transform_6, window_bounds = array<i64: 1, 8, 16>}]} {
    %c0 = arith.constant 0 : index
    %c0_0 = arith.constant 0 : index
    %c0_1 = arith.constant 0 : index
    %0 = vector.load %arg1[%c0, %c0_0, %c0_1] : memref<1x8x32xf32, #tpu.memory_space<vmem>>, vector<1x8x32xf32>
    %1 = vector.shape_cast %0 : vector<1x8x32xf32> to vector<8x32xf32>
    %c0_2 = arith.constant 0 : index
    %c0_3 = arith.constant 0 : index
    %2 = vector.load %arg2[%c0_2, %c0_3] : memref<2x32xf32, #tpu.memory_space<vmem>>, vector<2x32xf32>
    %3 = vector.extract_strided_slice %2 {offsets = [0, 0], sizes = [1, 32], strides = [1, 1]} : vector<2x32xf32> to vector<1x32xf32>
    %4 = vector.extract_strided_slice %2 {offsets = [1, 0], sizes = [1, 32], strides = [1, 1]} : vector<2x32xf32> to vector<1x32xf32>
    %c0_4 = arith.constant 0 : index
    %c0_5 = arith.constant 0 : index
    %5 = vector.load %arg3[%c0_4, %c0_5] : memref<8x24xf32, #tpu.memory_space<vmem>>, vector<8x24xf32>
    %c0_6 = arith.constant 0 : index
    %c0_7 = arith.constant 0 : index
    %c0_8 = arith.constant 0 : index
    %6 = vector.load %arg6[%c0_6, %c0_7, %c0_8] : memref<3x8x1xf32, #tpu.memory_space<vmem>>, vector<1x8x1xf32>
    %7 = vector.shape_cast %6 : vector<1x8x1xf32> to vector<8x1xf32>
    %8 = vector.extract_strided_slice %1 {offsets = [0, 31], sizes = [8, 1], strides = [1, 1]} : vector<8x32xf32> to vector<8x1xf32>
    %9 = vector.extract_strided_slice %1 {offsets = [0, 0], sizes = [8, 31], strides = [1, 1]} : vector<8x32xf32> to vector<8x31xf32>
    %10 = tpu.concatenate %8, %9 in 1 : vector<8x1xf32>, vector<8x31xf32> -> vector<8x32xf32>
    %11 = vector.broadcast %3 : vector<1x32xf32> to vector<8x32xf32>
    %12 = arith.mulf %10, %11 : vector<8x32xf32>
    %13 = vector.extract_strided_slice %1 {offsets = [0, 1], sizes = [8, 31], strides = [1, 1]} : vector<8x32xf32> to vector<8x31xf32>
    %14 = vector.extract_strided_slice %1 {offsets = [0, 0], sizes = [8, 1], strides = [1, 1]} : vector<8x32xf32> to vector<8x1xf32>
    %15 = tpu.concatenate %13, %14 in 1 : vector<8x31xf32>, vector<8x1xf32> -> vector<8x32xf32>
    %16 = vector.broadcast %4 : vector<1x32xf32> to vector<8x32xf32>
    %17 = arith.mulf %15, %16 : vector<8x32xf32>
    %18 = tpu.concatenate %12, %1, %17 in 0 : vector<8x32xf32>, vector<8x32xf32>, vector<8x32xf32> -> vector<24x32xf32>
    %cst = arith.constant dense<0.000000e+00> : vector<8x32xf32>
    %19 = tpu.matmul %5, %18, %cst {dimension_numbers = #tpu.dot_dimension_numbers<[1], [0], [0], [1], [0, 0, 1, 1], [], []>} : vector<8x24xf32>, vector<24x32xf32>, vector<8x32xf32> -> vector<8x32xf32>
    %20 = vector.broadcast %7 : vector<8x1xf32> to vector<8x32xf32>
    %21 = arith.addf %19, %20 : vector<8x32xf32>
    %cst_9 = arith.constant 0.000000e+00 : f32
    %22 = vector.broadcast %cst_9 : f32 to vector<8x32xf32>
    %23 = arith.maximumf %21, %22 : vector<8x32xf32>
    %c0_10 = arith.constant 0 : index
    %c0_11 = arith.constant 0 : index
    %24 = vector.load %arg4[%c0_10, %c0_11] : memref<8x24xf32, #tpu.memory_space<vmem>>, vector<8x24xf32>
    %c1 = arith.constant 1 : index
    %c0_12 = arith.constant 0 : index
    %c0_13 = arith.constant 0 : index
    %25 = vector.load %arg6[%c1, %c0_12, %c0_13] : memref<3x8x1xf32, #tpu.memory_space<vmem>>, vector<1x8x1xf32>
    %26 = vector.shape_cast %25 : vector<1x8x1xf32> to vector<8x1xf32>
    %27 = vector.extract_strided_slice %23 {offsets = [0, 31], sizes = [8, 1], strides = [1, 1]} : vector<8x32xf32> to vector<8x1xf32>
    %28 = vector.extract_strided_slice %23 {offsets = [0, 0], sizes = [8, 31], strides = [1, 1]} : vector<8x32xf32> to vector<8x31xf32>
    %29 = tpu.concatenate %27, %28 in 1 : vector<8x1xf32>, vector<8x31xf32> -> vector<8x32xf32>
    %30 = vector.broadcast %3 : vector<1x32xf32> to vector<8x32xf32>
    %31 = arith.mulf %29, %30 : vector<8x32xf32>
    %32 = vector.extract_strided_slice %23 {offsets = [0, 1], sizes = [8, 31], strides = [1, 1]} : vector<8x32xf32> to vector<8x31xf32>
    %33 = vector.extract_strided_slice %23 {offsets = [0, 0], sizes = [8, 1], strides = [1, 1]} : vector<8x32xf32> to vector<8x1xf32>
    %34 = tpu.concatenate %32, %33 in 1 : vector<8x31xf32>, vector<8x1xf32> -> vector<8x32xf32>
    %35 = vector.broadcast %4 : vector<1x32xf32> to vector<8x32xf32>
    %36 = arith.mulf %34, %35 : vector<8x32xf32>
    %37 = tpu.concatenate %31, %23, %36 in 0 : vector<8x32xf32>, vector<8x32xf32>, vector<8x32xf32> -> vector<24x32xf32>
    %cst_14 = arith.constant dense<0.000000e+00> : vector<8x32xf32>
    %38 = tpu.matmul %24, %37, %cst_14 {dimension_numbers = #tpu.dot_dimension_numbers<[1], [0], [0], [1], [0, 0, 1, 1], [], []>} : vector<8x24xf32>, vector<24x32xf32>, vector<8x32xf32> -> vector<8x32xf32>
    %39 = vector.broadcast %26 : vector<8x1xf32> to vector<8x32xf32>
    %40 = arith.addf %38, %39 : vector<8x32xf32>
    %cst_15 = arith.constant 0.000000e+00 : f32
    %41 = vector.broadcast %cst_15 : f32 to vector<8x32xf32>
    %42 = arith.maximumf %40, %41 : vector<8x32xf32>
    %c0_16 = arith.constant 0 : index
    %c0_17 = arith.constant 0 : index
    %43 = vector.load %arg5[%c0_16, %c0_17] : memref<8x24xf32, #tpu.memory_space<vmem>>, vector<8x24xf32>
    %c2 = arith.constant 2 : index
    %c0_18 = arith.constant 0 : index
    %c0_19 = arith.constant 0 : index
    %44 = vector.load %arg6[%c2, %c0_18, %c0_19] : memref<3x8x1xf32, #tpu.memory_space<vmem>>, vector<1x8x1xf32>
    %45 = vector.shape_cast %44 : vector<1x8x1xf32> to vector<8x1xf32>
    %46 = vector.extract_strided_slice %42 {offsets = [0, 31], sizes = [8, 1], strides = [1, 1]} : vector<8x32xf32> to vector<8x1xf32>
    %47 = vector.extract_strided_slice %42 {offsets = [0, 0], sizes = [8, 31], strides = [1, 1]} : vector<8x32xf32> to vector<8x31xf32>
    %48 = tpu.concatenate %46, %47 in 1 : vector<8x1xf32>, vector<8x31xf32> -> vector<8x32xf32>
    %49 = vector.broadcast %3 : vector<1x32xf32> to vector<8x32xf32>
    %50 = arith.mulf %48, %49 : vector<8x32xf32>
    %51 = vector.extract_strided_slice %42 {offsets = [0, 1], sizes = [8, 31], strides = [1, 1]} : vector<8x32xf32> to vector<8x31xf32>
    %52 = vector.extract_strided_slice %42 {offsets = [0, 0], sizes = [8, 1], strides = [1, 1]} : vector<8x32xf32> to vector<8x1xf32>
    %53 = tpu.concatenate %51, %52 in 1 : vector<8x31xf32>, vector<8x1xf32> -> vector<8x32xf32>
    %54 = vector.broadcast %4 : vector<1x32xf32> to vector<8x32xf32>
    %55 = arith.mulf %53, %54 : vector<8x32xf32>
    %56 = tpu.concatenate %50, %42, %55 in 0 : vector<8x32xf32>, vector<8x32xf32>, vector<8x32xf32> -> vector<24x32xf32>
    %cst_20 = arith.constant dense<0.000000e+00> : vector<8x32xf32>
    %57 = tpu.matmul %43, %56, %cst_20 {dimension_numbers = #tpu.dot_dimension_numbers<[1], [0], [0], [1], [0, 0, 1, 1], [], []>} : vector<8x24xf32>, vector<24x32xf32>, vector<8x32xf32> -> vector<8x32xf32>
    %58 = vector.broadcast %45 : vector<8x1xf32> to vector<8x32xf32>
    %59 = arith.addf %57, %58 : vector<8x32xf32>
    %cst_21 = arith.constant 0.000000e+00 : f32
    %60 = vector.broadcast %cst_21 : f32 to vector<8x32xf32>
    %61 = arith.maximumf %59, %60 : vector<8x32xf32>
    %62 = vector.shape_cast %61 : vector<8x32xf32> to vector<8x16x2xf32>
    %cst_22 = arith.constant dense<0xFF800000> : vector<8x16xf32>
    %63 = vector.multi_reduction <maximumf>, %62, %cst_22 [2] : vector<8x16x2xf32> to vector<8x16xf32>
    %c0_23 = arith.constant 0 : index
    %c0_24 = arith.constant 0 : index
    %c0_25 = arith.constant 0 : index
    %64 = vector.load %arg7[%c0_23, %c0_24, %c0_25] : memref<1x8x16xf32, #tpu.memory_space<vmem>>, vector<1x8x16xf32>
    %65 = vector.shape_cast %64 : vector<1x8x16xf32> to vector<8x16xf32>
    %66 = vector.shape_cast %63 : vector<8x16xf32> to vector<1x8x16xf32>
    tpu.vector_store %arg7[%c0_23, %c0_24, %c0_25], %66 {strides = array<i32>} : memref<1x8x16xf32, #tpu.memory_space<vmem>>, vector<1x8x16xf32>,
    return
  }
  func.func @transform_0(%arg0: i32) -> (i32, i32, i32) {
    %c0_i32 = arith.constant 0 : i32
    %c0_i32_0 = arith.constant 0 : i32
    %c0_i32_1 = arith.constant 0 : i32
    return %arg0, %c0_i32, %c0_i32_0 : i32, i32, i32
  }
  func.func @transform_1(%arg0: i32) -> (i32, i32) {
    %c0_i32 = arith.constant 0 : i32
    %c0_i32_0 = arith.constant 0 : i32
    %c0_i32_1 = arith.constant 0 : i32
    return %c0_i32, %c0_i32_0 : i32, i32
  }
  func.func @transform_2(%arg0: i32) -> (i32, i32) {
    %c0_i32 = arith.constant 0 : i32
    %c0_i32_0 = arith.constant 0 : i32
    %c0_i32_1 = arith.constant 0 : i32
    return %c0_i32, %c0_i32_0 : i32, i32
  }
  func.func @transform_3(%arg0: i32) -> (i32, i32) {
    %c0_i32 = arith.constant 0 : i32
    %c0_i32_0 = arith.constant 0 : i32
    %c0_i32_1 = arith.constant 0 : i32
    return %c0_i32, %c0_i32_0 : i32, i32
  }
  func.func @transform_4(%arg0: i32) -> (i32, i32) {
    %c0_i32 = arith.constant 0 : i32
    %c0_i32_0 = arith.constant 0 : i32
    %c0_i32_1 = arith.constant 0 : i32
    return %c0_i32, %c0_i32_0 : i32, i32
  }
  func.func @transform_5(%arg0: i32) -> (i32, i32, i32) {
    %c0_i32 = arith.constant 0 : i32
    %c0_i32_0 = arith.constant 0 : i32
    %c0_i32_1 = arith.constant 0 : i32
    %c0_i32_2 = arith.constant 0 : i32
    return %c0_i32, %c0_i32_0, %c0_i32_1 : i32, i32, i32
  }
  func.func @transform_6(%arg0: i32) -> (i32, i32, i32) {
    %c0_i32 = arith.constant 0 : i32
    %c0_i32_0 = arith.constant 0 : i32
    %c0_i32_1 = arith.constant 0 : i32
    return %arg0, %c0_i32, %c0_i32_0 : i32, i32, i32
  }
}

module attributes {stable_mosaic.version = 11 : i64} {
  func.func @basic_conv1d_b_kernel(%arg0: i32, %arg1: memref<1x8x32xf32, #tpu.memory_space<vmem>>, %arg2: memref<2x32xf32, #tpu.memory_space<vmem>>, %arg3: memref<8x24xf32, #tpu.memory_space<vmem>>, %arg4: memref<8x24xf32, #tpu.memory_space<vmem>>, %arg5: memref<8x24xf32, #tpu.memory_space<vmem>>, %arg6: memref<3x8x1xf32, #tpu.memory_space<vmem>>, %arg7: memref<1x8x32xf32, #tpu.memory_space<vmem>>) attributes {dimension_semantics = [#tpu.dimension_semantics<parallel>], iteration_bounds = array<i64: 1>, scalar_prefetch = 0 : i64, scratch_operands = 0 : i64, tpu.core_type = #tpu.core_type<tc>, window_params = [{transform_indices = @transform_0, window_bounds = array<i64: 1, 8, 32>}, {pipeline_mode = #tpu.pipeline_mode<synchronous>, transform_indices = @transform_1, window_bounds = array<i64: 2, 32>}, {pipeline_mode = #tpu.pipeline_mode<synchronous>, transform_indices = @transform_2, window_bounds = array<i64: 8, 24>}, {pipeline_mode = #tpu.pipeline_mode<synchronous>, transform_indices = @transform_3, window_bounds = array<i64: 8, 24>}, {pipeline_mode = #tpu.pipeline_mode<synchronous>, transform_indices = @transform_4, window_bounds = array<i64: 8, 24>}, {pipeline_mode = #tpu.pipeline_mode<synchronous>, transform_indices = @transform_5, window_bounds = array<i64: 3, 8, 1>}, {transform_indices = @transform_6, window_bounds = array<i64: 1, 8, 32>}]} {
    %c0 = arith.constant 0 : index
    %c0_0 = arith.constant 0 : index
    %c0_1 = arith.constant 0 : index
    %0 = vector.load %arg1[%c0, %c0_0, %c0_1] : memref<1x8x32xf32, #tpu.memory_space<vmem>>, vector<1x8x32xf32>
    %1 = vector.shape_cast %0 : vector<1x8x32xf32> to vector<8x32xf32>
    %c0_2 = arith.constant 0 : index
    %c0_3 = arith.constant 0 : index
    %2 = vector.load %arg2[%c0_2, %c0_3] : memref<2x32xf32, #tpu.memory_space<vmem>>, vector<2x32xf32>
    %3 = vector.extract_strided_slice %2 {offsets = [0, 0], sizes = [1, 32], strides = [1, 1]} : vector<2x32xf32> to vector<1x32xf32>
    %4 = vector.extract_strided_slice %2 {offsets = [1, 0], sizes = [1, 32], strides = [1, 1]} : vector<2x32xf32> to vector<1x32xf32>
    %c0_4 = arith.constant 0 : index
    %c0_5 = arith.constant 0 : index
    %5 = vector.load %arg3[%c0_4, %c0_5] : memref<8x24xf32, #tpu.memory_space<vmem>>, vector<8x24xf32>
    %c0_6 = arith.constant 0 : index
    %c0_7 = arith.constant 0 : index
    %c0_8 = arith.constant 0 : index
    %6 = vector.load %arg6[%c0_6, %c0_7, %c0_8] : memref<3x8x1xf32, #tpu.memory_space<vmem>>, vector<1x8x1xf32>
    %7 = vector.shape_cast %6 : vector<1x8x1xf32> to vector<8x1xf32>
    %8 = vector.extract_strided_slice %1 {offsets = [0, 31], sizes = [8, 1], strides = [1, 1]} : vector<8x32xf32> to vector<8x1xf32>
    %9 = vector.extract_strided_slice %1 {offsets = [0, 0], sizes = [8, 31], strides = [1, 1]} : vector<8x32xf32> to vector<8x31xf32>
    %10 = tpu.concatenate %8, %9 in 1 : vector<8x1xf32>, vector<8x31xf32> -> vector<8x32xf32>
    %11 = vector.broadcast %3 : vector<1x32xf32> to vector<8x32xf32>
    %12 = arith.mulf %10, %11 : vector<8x32xf32>
    %13 = vector.extract_strided_slice %1 {offsets = [0, 1], sizes = [8, 31], strides = [1, 1]} : vector<8x32xf32> to vector<8x31xf32>
    %14 = vector.extract_strided_slice %1 {offsets = [0, 0], sizes = [8, 1], strides = [1, 1]} : vector<8x32xf32> to vector<8x1xf32>
    %15 = tpu.concatenate %13, %14 in 1 : vector<8x31xf32>, vector<8x1xf32> -> vector<8x32xf32>
    %16 = vector.broadcast %4 : vector<1x32xf32> to vector<8x32xf32>
    %17 = arith.mulf %15, %16 : vector<8x32xf32>
    %18 = tpu.concatenate %12, %1, %17 in 0 : vector<8x32xf32>, vector<8x32xf32>, vector<8x32xf32> -> vector<24x32xf32>
    %cst = arith.constant dense<0.000000e+00> : vector<8x32xf32>
    %19 = tpu.matmul %5, %18, %cst {dimension_numbers = #tpu.dot_dimension_numbers<[1], [0], [0], [1], [0, 0, 1, 1], [], []>} : vector<8x24xf32>, vector<24x32xf32>, vector<8x32xf32> -> vector<8x32xf32>
    %20 = vector.broadcast %7 : vector<8x1xf32> to vector<8x32xf32>
    %21 = arith.addf %19, %20 : vector<8x32xf32>
    %cst_9 = arith.constant 0.000000e+00 : f32
    %22 = vector.broadcast %cst_9 : f32 to vector<8x32xf32>
    %23 = arith.maximumf %21, %22 : vector<8x32xf32>
    %c0_10 = arith.constant 0 : index
    %c0_11 = arith.constant 0 : index
    %24 = vector.load %arg4[%c0_10, %c0_11] : memref<8x24xf32, #tpu.memory_space<vmem>>, vector<8x24xf32>
    %c1 = arith.constant 1 : index
    %c0_12 = arith.constant 0 : index
    %c0_13 = arith.constant 0 : index
    %25 = vector.load %arg6[%c1, %c0_12, %c0_13] : memref<3x8x1xf32, #tpu.memory_space<vmem>>, vector<1x8x1xf32>
    %26 = vector.shape_cast %25 : vector<1x8x1xf32> to vector<8x1xf32>
    %27 = vector.extract_strided_slice %23 {offsets = [0, 31], sizes = [8, 1], strides = [1, 1]} : vector<8x32xf32> to vector<8x1xf32>
    %28 = vector.extract_strided_slice %23 {offsets = [0, 0], sizes = [8, 31], strides = [1, 1]} : vector<8x32xf32> to vector<8x31xf32>
    %29 = tpu.concatenate %27, %28 in 1 : vector<8x1xf32>, vector<8x31xf32> -> vector<8x32xf32>
    %30 = vector.broadcast %3 : vector<1x32xf32> to vector<8x32xf32>
    %31 = arith.mulf %29, %30 : vector<8x32xf32>
    %32 = vector.extract_strided_slice %23 {offsets = [0, 1], sizes = [8, 31], strides = [1, 1]} : vector<8x32xf32> to vector<8x31xf32>
    %33 = vector.extract_strided_slice %23 {offsets = [0, 0], sizes = [8, 1], strides = [1, 1]} : vector<8x32xf32> to vector<8x1xf32>
    %34 = tpu.concatenate %32, %33 in 1 : vector<8x31xf32>, vector<8x1xf32> -> vector<8x32xf32>
    %35 = vector.broadcast %4 : vector<1x32xf32> to vector<8x32xf32>
    %36 = arith.mulf %34, %35 : vector<8x32xf32>
    %37 = tpu.concatenate %31, %23, %36 in 0 : vector<8x32xf32>, vector<8x32xf32>, vector<8x32xf32> -> vector<24x32xf32>
    %cst_14 = arith.constant dense<0.000000e+00> : vector<8x32xf32>
    %38 = tpu.matmul %24, %37, %cst_14 {dimension_numbers = #tpu.dot_dimension_numbers<[1], [0], [0], [1], [0, 0, 1, 1], [], []>} : vector<8x24xf32>, vector<24x32xf32>, vector<8x32xf32> -> vector<8x32xf32>
    %39 = vector.broadcast %26 : vector<8x1xf32> to vector<8x32xf32>
    %40 = arith.addf %38, %39 : vector<8x32xf32>
    %cst_15 = arith.constant 0.000000e+00 : f32
    %41 = vector.broadcast %cst_15 : f32 to vector<8x32xf32>
    %42 = arith.maximumf %40, %41 : vector<8x32xf32>
    %c0_16 = arith.constant 0 : index
    %c0_17 = arith.constant 0 : index
    %43 = vector.load %arg5[%c0_16, %c0_17] : memref<8x24xf32, #tpu.memory_space<vmem>>, vector<8x24xf32>
    %c2 = arith.constant 2 : index
    %c0_18 = arith.constant 0 : index
    %c0_19 = arith.constant 0 : index
    %44 = vector.load %arg6[%c2, %c0_18, %c0_19] : memref<3x8x1xf32, #tpu.memory_space<vmem>>, vector<1x8x1xf32>
    %45 = vector.shape_cast %44 : vector<1x8x1xf32> to vector<8x1xf32>
    %46 = vector.extract_strided_slice %42 {offsets = [0, 31], sizes = [8, 1], strides = [1, 1]} : vector<8x32xf32> to vector<8x1xf32>
    %47 = vector.extract_strided_slice %42 {offsets = [0, 0], sizes = [8, 31], strides = [1, 1]} : vector<8x32xf32> to vector<8x31xf32>
    %48 = tpu.concatenate %46, %47 in 1 : vector<8x1xf32>, vector<8x31xf32> -> vector<8x32xf32>
    %49 = vector.broadcast %3 : vector<1x32xf32> to vector<8x32xf32>
    %50 = arith.mulf %48, %49 : vector<8x32xf32>
    %51 = vector.extract_strided_slice %42 {offsets = [0, 1], sizes = [8, 31], strides = [1, 1]} : vector<8x32xf32> to vector<8x31xf32>
    %52 = vector.extract_strided_slice %42 {offsets = [0, 0], sizes = [8, 1], strides = [1, 1]} : vector<8x32xf32> to vector<8x1xf32>
    %53 = tpu.concatenate %51, %52 in 1 : vector<8x31xf32>, vector<8x1xf32> -> vector<8x32xf32>
    %54 = vector.broadcast %4 : vector<1x32xf32> to vector<8x32xf32>
    %55 = arith.mulf %53, %54 : vector<8x32xf32>
    %56 = tpu.concatenate %50, %42, %55 in 0 : vector<8x32xf32>, vector<8x32xf32>, vector<8x32xf32> -> vector<24x32xf32>
    %cst_20 = arith.constant dense<0.000000e+00> : vector<8x32xf32>
    %57 = tpu.matmul %43, %56, %cst_20 {dimension_numbers = #tpu.dot_dimension_numbers<[1], [0], [0], [1], [0, 0, 1, 1], [], []>} : vector<8x24xf32>, vector<24x32xf32>, vector<8x32xf32> -> vector<8x32xf32>
    %58 = vector.broadcast %45 : vector<8x1xf32> to vector<8x32xf32>
    %59 = arith.addf %57, %58 : vector<8x32xf32>
    %cst_21 = arith.constant 0.000000e+00 : f32
    %60 = vector.broadcast %cst_21 : f32 to vector<8x32xf32>
    %61 = arith.maximumf %59, %60 : vector<8x32xf32>
    %c0_22 = arith.constant 0 : index
    %c0_23 = arith.constant 0 : index
    %c0_24 = arith.constant 0 : index
    %62 = vector.load %arg7[%c0_22, %c0_23, %c0_24] : memref<1x8x32xf32, #tpu.memory_space<vmem>>, vector<1x8x32xf32>
    %63 = vector.shape_cast %62 : vector<1x8x32xf32> to vector<8x32xf32>
    %64 = vector.shape_cast %61 : vector<8x32xf32> to vector<1x8x32xf32>
    tpu.vector_store %arg7[%c0_22, %c0_23, %c0_24], %64 {strides = array<i32>} : memref<1x8x32xf32, #tpu.memory_space<vmem>>, vector<1x8x32xf32>,
    return
  }
  func.func @transform_0(%arg0: i32) -> (i32, i32, i32) {
    %c0_i32 = arith.constant 0 : i32
    %c0_i32_0 = arith.constant 0 : i32
    %c0_i32_1 = arith.constant 0 : i32
    return %arg0, %c0_i32, %c0_i32_0 : i32, i32, i32
  }
  func.func @transform_1(%arg0: i32) -> (i32, i32) {
    %c0_i32 = arith.constant 0 : i32
    %c0_i32_0 = arith.constant 0 : i32
    %c0_i32_1 = arith.constant 0 : i32
    return %c0_i32, %c0_i32_0 : i32, i32
  }
  func.func @transform_2(%arg0: i32) -> (i32, i32) {
    %c0_i32 = arith.constant 0 : i32
    %c0_i32_0 = arith.constant 0 : i32
    %c0_i32_1 = arith.constant 0 : i32
    return %c0_i32, %c0_i32_0 : i32, i32
  }
  func.func @transform_3(%arg0: i32) -> (i32, i32) {
    %c0_i32 = arith.constant 0 : i32
    %c0_i32_0 = arith.constant 0 : i32
    %c0_i32_1 = arith.constant 0 : i32
    return %c0_i32, %c0_i32_0 : i32, i32
  }
  func.func @transform_4(%arg0: i32) -> (i32, i32) {
    %c0_i32 = arith.constant 0 : i32
    %c0_i32_0 = arith.constant 0 : i32
    %c0_i32_1 = arith.constant 0 : i32
    return %c0_i32, %c0_i32_0 : i32, i32
  }
  func.func @transform_5(%arg0: i32) -> (i32, i32, i32) {
    %c0_i32 = arith.constant 0 : i32
    %c0_i32_0 = arith.constant 0 : i32
    %c0_i32_1 = arith.constant 0 : i32
    %c0_i32_2 = arith.constant 0 : i32
    return %c0_i32, %c0_i32_0, %c0_i32_1 : i32, i32, i32
  }
  func.func @transform_6(%arg0: i32) -> (i32, i32, i32) {
    %c0_i32 = arith.constant 0 : i32
    %c0_i32_0 = arith.constant 0 : i32
    %c0_i32_1 = arith.constant 0 : i32
    return %arg0, %c0_i32, %c0_i32_0 : i32, i32, i32
  }
}

</mosaic_0001>

<bundles_post_ra>
// kernel: tpu_custom_call.1
= control target key start
LH: loop header
LB: loop body
LE: loop exit
PB: predicated region body
PF: predicated region fallthrough
CT: control target
= control target key end

     0   :  { %v35_v1 = vlaneseq  ;;  %s972_s23 = smov 32   ;;  %s1252_s0 = inlined_call_operand.vmem [shape: f32[1,8,32], index: 0, kind: input, shape index: {}]   ;;  %s1253_s1 = inlined_call_operand.vmem [shape: f32[2,32], index: 1, kind: input, shape index: {}]   ;;  %s1254_s2 = inlined_call_operand.vmem [shape: f32[8,24], index: 2, kind: input, shape index: {}]   ;;  %s1255_s3 = inlined_call_operand.vmem [shape: f32[8,24], index: 3, kind: input, shape index: {}]   ;;  %s1256_s4 = inlined_call_operand.vmem [shape: f32[8,24], index: 4, kind: input, shape index: {}]   ;;  %s1257_s5 = inlined_call_operand.vmem [shape: f32[3,8,1], index: 5, kind: input, shape index: {}]   ;;  %s1258_s6 = inlined_call_operand.hbm [shape: f32[1,8,16], index: 6, kind: output, shape index: {}]  }
   0x1   :  { %v24_v0 = vld [vmem:[%s1252_s0] sm:$0xff] }
   0x2   :  { %29 = vrot.lane.b32.xlu0 %v24_v0, %s972_s23  ;;  %v1038_v2 = vshrl.u32 %v35_v1, 7  ;;  %v745_v3 = vand.u32 127, %v35_v1 }
   0x3   :  { %11 = vsyncpa [#allocation3], 0  ;;  %v25_v4 = vld [vmem:[%s1253_s1] sm:$0x3]  ;;  %s973_s0 = smov 1   ;;  %s974_s26 = smov 31  }
   0x4   :  { %v37_v5 = vsub.s32 0, %v1038_v2  ;;  %v46_v6 = vsub.s32 1, %v1038_v2  ;;  %v1046_v7 = vsub.s32 %v745_v3, %v1038_v2  ;;  %v750_v8 = vadd.s32 4294967288, %v745_v3  ;;  %s976_s1 = smov 30   ;;  %s977_s27 = smov 97   ;;  %v27_v24 = vld [vmem:[%s1257_s5] sm:$0xff] }
   0x5   :  { %vm28_vm0 = vcmask 1047808   ;;  %v975_v15 = vmov 0.0|0.0   ;;  %vm978_vm1 = vmmov 0   ;;  %v979_v23 = vmov 0.0   ;;  %v26_v31 = vld [vmem:[%s1254_s2] sm:$0xff]  ;;  %v852_v46 = vld [vmem:[%s1257_s5 + $0x8] sm:$0xff] }
   0x6   :  { %v47_v9 = vrot.slane %v25_v4, %v46_v6  ;;  %v1049_v10 = vsub.s32 %v750_v8, %v1038_v2  ;;  %v38_v11 = vrot.slane %v25_v4, %v37_v5  ;;  %895 = vmatprep.subr.bf16.mxu0 %v975_v15  ;;  %898 = vmatprep.subr.bf16.mxu1 %v975_v15  ;;  %v980_v25 = vmov 0   ;;  %v149_v52 = vld [vmem:[%s1255_s3] sm:$0xff]  ;;  %v854_v4 = vld [vmem:[%s1257_s5 + $0x10] sm:$0xff]  ;;  %s981_s5 = smov 124   ;;  %s982_s14 = smov 126  }
   0x7   :  { %874 = vmatprep.mubr.msk.f32.mxu0 %vm978_vm1, %v979_v23  ;;  %883 = vmatprep.mubr.msk.f32.mxu1 %vm978_vm1, %v979_v23  ;;  %vm74_vm2 = vcmask 195584   ;;  %s983_s15 = smov 120   ;;  %s985_s16 = smov 116   ;;  %vm679_vm3 = vcmask 15360   ;;  %vm755_vm4 = vcmask 130112   ;;  %vm820_vm5 = vcmask 1041409  }
   0x8   :  { %49 = vrot.lane.b32.xlu1 %v47_v9, %s973_s0  ;;  %936 = vset.pattern.permute.xlu0 %v980_v25  ;;  %s986_s17 = smov 118   ;;  %s987_s18 = smov 112   ;;  %vm822_vm6 = vcmask 1042434   ;;  %vm824_vm7 = vcmask 1043459   ;;  %vm826_vm8 = vcmask 1044484   ;;  %vm828_vm9 = vcmask 1045509  }
   0x9   :  { %947 = vset.pattern.permute.xlu1 %v980_v25  ;;  %s988_s19 = smov 114   ;;  %s989_s20 = smov 108   ;;  %vm830_vm10 = vcmask 1046534   ;;  %vm832_vm11 = vcmask 1047559   ;;  %vm835_vm12 = vcmask 130048  }
   0xa   :  { %s990_s21 = smov 110   ;;  %s991_s22 = smov 104  }
   0xb   :  { %s993_s24 = smov 100   ;;  %s994_s25 = smov 102  }
   0xc   :  { %40 = vrot.lane.b32.xlu1 %v38_v11, %s974_s26  ;;  %s995_s0 = smov 98  }
  0x74   :  { %v30_v12 = vpop.permute.xlu0 %29 }
  0x75   :  { %v31_v13 = vsel %vm28_vm0, %v30_v12, %v24_v0  ;;  %v255_v12 = vld [vmem:[%s1256_s4] sm:$0xff]  ;;  %s984_s4 = smov 122  }
  0x76   :  { %32 = vrot.lane.b32.xlu0 %v31_v13, %s972_s23 }
  0x7a   :  { %54 = vrot.lane.b32.xlu0 %v24_v0, %s974_s26  ;;  %v1055_v14 = vpop.permute.xlu1 %49 }
  0x7e   :  { %v1057_v16 = vpop.permute.xlu1 %40 }
  0xe8   :  { %v33_v17 = vpop.permute.xlu0 %32 }
  0xe9   :  { %v34_v18 = vsel %vm28_vm0, %v33_v17, %v24_v0 }
  0xea   :  { %v52_v19 = vmul.f32 %v1055_v14, %v34_v18  ;;  %v43_v20 = vmul.f32 %v1057_v16, %v34_v18 }
  0xec   :  { %57 = vrot.lane.b32.xlu1 %v52_v19, %s976_s1  ;;  %v55_v21 = vpop.permute.xlu0 %54 }
  0xed   :  { %v931_v22 = vpack.i.bf16 %v55_v21, %v43_v20  ;;  %v996_v21 = vmov 1983009808  }
  0xef   :  { %932 = vrot.lane.b32.xlu0 %v931_v22, %s977_s27  ;;  %v410_v22 = vunpack.c.l.s4 %v996_v21 }
  0xf1   :  { %v411_v25 = vunpack.c.0.s8 %v410_v22 }
  0xf3   :  { %61 = vperm.xlu0 %936, %v27_v24  }
 0x15e   :  { %v58_v26 = vpop.permute.xlu1 %57 }
 0x15f   :  { %69 = vrot.lane.b32.xlu1 %v58_v26, %s977_s27  ;;  %v997_v26 = vmov 1934713408  }
 0x161   :  { %v933_v27 = vpop.permute.xlu0 %932 }
 0x162   :  { %v935_v28 = vunpack.i.h.bf16 %v933_v27  ;;  %v934_v29 = vunpack.i.l.bf16 %v933_v27  ;;  %v474_v27 = vunpack.c.l.s4 %v997_v26 }
 0x164   :  { %v896_v30 = vpack.c.bf16 %v935_v28, %v934_v29 }
 0x166   :  { %897 = vmatpush3.bf16.msra.mxu0 %v896_v30 }
 0x167   :  { %872 = vmatprep.subr.mxu0 %v979_v23 }
 0x172   :  { %v62_v33 = vpop.permute.xlu0 %61 }
 0x1d1   :  { %v70_v32 = vpop.permute.xlu1 %69 }
 0x1d2   :  { %873 = vmatpush3.msra.mxu0 %v70_v32 }
 0x1d3   :  { %875 = vmatmul.mubr.msk.f32.vlgmr.msra.gmra.mrb[0].mxu0 %vm74_vm2, %v26_v31  ;;  %901 = vmatprep.subr.bf16.mxu0 %v975_v15  ;;  %v1145_v31 = vsub.s32 %v411_v25, %v1038_v2 }
 0x1d4   :  { %892 = vmatprep.mubr.msk.f32.mxu0 %vm978_vm1, %v979_v23 }
 0x2a6   :  { %v144_v34 = vpop.f32.mrb[0].mxu0 }
 0x2a7   :  { %v145_v35 = vadd.f32 %v144_v34, %v62_v33  ;;  %v876_v36 = vpop.f32.mrb[1].mxu0  ;;  %v475_v33 = vunpack.c.0.s8 %v474_v27 }
 0x2a9   :  { %v148_v37 = vmax.f32 %v145_v35, 0.0 }
 0x2ab   :  { %161 = vrot.lane.b32.xlu0 %v148_v37, %s974_s26  ;;  %152 = vrot.lane.b32.xlu1 %v148_v37, %s972_s23 }
 0x31d   :  { %v153_v38 = vpop.permute.xlu1 %152  ;;  %v162_v44 = vpop.permute.xlu0 %161 }
 0x31e   :  { %v154_v39 = vsel %vm28_vm0, %v153_v38, %v148_v37 }
 0x31f   :  { %155 = vrot.lane.b32.xlu1 %v154_v39, %s972_s23 }
 0x391   :  { %v156_v40 = vpop.permute.xlu1 %155 }
 0x392   :  { %v157_v41 = vsel %vm28_vm0, %v156_v40, %v148_v37  ;;  %v1158_v40 = vsub.s32 %v475_v33, %v1038_v2 }
 0x393   :  { %v158_v42 = vmul.f32 %v157_v41, %v1057_v16  ;;  %v159_v43 = vmul.f32 %v157_v41, %v1055_v14 }
 0x395   :  { %164 = vrot.lane.b32.xlu1 %v159_v43, %s976_s1  ;;  %v937_v45 = vpack.i.bf16 %v162_v44, %v158_v42 }
 0x397   :  { %938 = vrot.lane.b32.xlu0 %v937_v45, %s977_s27 }
 0x39b   :  { %168 = vperm.xlu0 %936, %v852_v46  }
 0x407   :  { %v165_v47 = vpop.permute.xlu1 %164 }
 0x408   :  { %176 = vrot.lane.b32.xlu1 %v165_v47, %s977_s27 }
 0x409   :  { %v939_v48 = vpop.permute.xlu0 %938 }
 0x40a   :  { %v941_v49 = vunpack.i.h.bf16 %v939_v48  ;;  %v940_v50 = vunpack.i.l.bf16 %v939_v48 }
 0x40c   :  { %v899_v51 = vpack.c.bf16 %v941_v49, %v940_v50 }
 0x40e   :  { %900 = vmatpush3.bf16.msra.mxu1 %v899_v51 }
 0x40f   :  { %881 = vmatprep.subr.mxu1 %v979_v23 }
 0x41a   :  { %v169_v54 = vpop.permute.xlu0 %168 }
 0x47a   :  { %v177_v53 = vpop.permute.xlu1 %176 }
 0x47b   :  { %882 = vmatpush3.msra.mxu1 %v177_v53 }
 0x47c   :  { %884 = vmatmul.mubr.msk.f32.vlgmr.msra.gmra.mrb[0].mxu1 %vm74_vm2, %v149_v52 }
 0x54f   :  { %v250_v55 = vpop.f32.mrb[0].mxu1 }
 0x550   :  { %v251_v56 = vadd.f32 %v250_v55, %v169_v54  ;;  %v885_v57 = vpop.f32.mrb[1].mxu1 }
 0x552   :  { %v254_v58 = vmax.f32 %v251_v56, 0.0 }
 0x554   :  { %258 = vrot.lane.b32.xlu1 %v254_v58, %s972_s23 }
 0x558   :  { %267 = vrot.lane.b32.xlu1 %v254_v58, %s974_s26  ;;  %s998_s26 = smov [#allocation2]  }
 0x5c6   :  { %v259_v59 = vpop.permute.xlu1 %258 }
 0x5c7   :  { %v260_v60 = vsel %vm28_vm0, %v259_v59, %v254_v58 }
 0x5c8   :  { %261 = vrot.lane.b32.xlu0 %v260_v60, %s972_s23  ;;  %s992_s23 = smov 106  }
 0x5ca   :  { %v268_v1 = vpop.permute.xlu1 %267 }
 0x63a   :  { %v262_v61 = vpop.permute.xlu0 %261 }
 0x63b   :  { %v263_v62 = vsel %vm28_vm0, %v262_v61, %v254_v58 }
 0x63c   :  { %v264_v63 = vmul.f32 %v263_v62, %v1057_v16  ;;  %v265_v0 = vmul.f32 %v263_v62, %v1055_v14 }
 0x63e   :  { %270 = vrot.lane.b32.xlu0 %v265_v0, %s976_s1  ;;  %v942_v3 = vpack.i.bf16 %v268_v1, %v264_v63  ;;  %s843_s1 = sshll.u32 %s998_s26, 4  ;;  %s844_s1 = int_to_ptr.vmem [resolvable:$true] %s843_s1 }
 0x63f   :  { %p953_p1 = scmp.lt.s32.totalorder %s844_s1, %s844_s1 }
 0x640   :  { %943 = vrot.lane.b32.xlu1 %v942_v3, %s977_s27 }
 0x644   :  { %274 = vperm.xlu1 %947, %v854_v4  }
 0x6b0   :  { %v271_v5 = vpop.permute.xlu0 %270 }
 0x6b1   :  { %282 = vrot.lane.b32.xlu0 %v271_v5, %s977_s27  ;;  %s948_s27 = scalar_lea.vmem %s844_s1, 128 }
 0x6b2   :  { %v944_v6 = vpop.permute.xlu1 %943  ;;  %p949_p0 = scmp.ne.s32.totalorder %s844_s1, %s948_s27  ;;  %p954_p2 = scmp.lt.s32.totalorder %s948_s27, %s948_s27 }
 0x6b3   :  { %v946_v8 = vunpack.i.h.bf16 %v944_v6  ;;  %v945_v9 = vunpack.i.l.bf16 %v944_v6 }
 0x6b4   :  { %p955_p3 = por %p954_p2, %p953_p1 }
 0x6b5   :  { %v902_v11 = vpack.c.bf16 %v946_v8, %v945_v9 }
 0x6b6   :  { %p956_p4 = pnand %p955_p3, %p949_p0 }
 0x6b7   :  { %903 = vmatpush3.bf16.msra.mxu0 %v902_v11 }
 0x6b8   :  { %890 = vmatprep.subr.mxu0 %v979_v23 }
 0x6c3   :  { %v275_v14 = vpop.permute.xlu1 %274 }
 0x723   :  { %v283_v13 = vpop.permute.xlu0 %282 }
 0x724   :  { %891 = vmatpush3.msra.mxu0 %v283_v13 }
 0x725   :  { %893 = vmatmul.mubr.msk.f32.vlgmr.msra.gmra.mrb[2].mxu0 %vm74_vm2, %v255_v12 }
 0x7f8   :  { %v356_v15 = vpop.f32.mrb[2].mxu0 }
 0x7f9   :  { %v357_v16 = vadd.f32 %v356_v15, %v275_v14  ;;  %v894_v17 = vpop.f32.mrb[3].mxu0 }
 0x7fb   :  { %v1115_v18 = vmax.f32 %v357_v16, 0.0 }
 0x7fd   :  { %365 = vrot.lane.b32.xlu1 %v1115_v18, %s981_s5  ;;  %362 = vrot.lane.b32.xlu0 %v1115_v18, %s982_s14 }
 0x801   :  { %371 = vrot.lane.b32.xlu1 %v1115_v18, %s983_s15  ;;  %368 = vrot.lane.b32.xlu0 %v1115_v18, %s984_s4 }
 0x805   :  { %377 = vrot.lane.b32.xlu1 %v1115_v18, %s985_s16  ;;  %374 = vrot.lane.b32.xlu0 %v1115_v18, %s986_s17 }
 0x809   :  { %383 = vrot.lane.b32.xlu1 %v1115_v18, %s987_s18  ;;  %380 = vrot.lane.b32.xlu0 %v1115_v18, %s988_s19 }
 0x80d   :  { %389 = vrot.lane.b32.xlu1 %v1115_v18, %s989_s20  ;;  %386 = vrot.lane.b32.xlu0 %v1115_v18, %s990_s21 }
 0x811   :  { %395 = vrot.lane.b32.xlu1 %v1115_v18, %s991_s22  ;;  %392 = vrot.lane.b32.xlu0 %v1115_v18, %s992_s23 }
 0x815   :  { %401 = vrot.lane.b32.xlu1 %v1115_v18, %s993_s24  ;;  %398 = vrot.lane.b32.xlu0 %v1115_v18, %s994_s25 }
 0x819   :  { %404 = vrot.lane.b32.xlu0 %v1115_v18, %s995_s0 }
 0x86f   :  { %v1132_v19 = vpop.permute.xlu1 %365  ;;  %v1134_v20 = vpop.permute.xlu0 %362 }
 0x870   :  { %v407_v32 = vcombine.low %v1115_v18, %v1132_v19  ;;  %v408_v8 = vcombine.high %v1115_v18, %v1132_v19 }
 0x872   :  { %v1155_v38 = vrot.slane %v407_v32, %v1145_v31 }
 0x873   :  { %v1136_v23 = vpop.permute.xlu1 %371  ;;  %v1138_v24 = vpop.permute.xlu0 %368 }
 0x874   :  { %v423_v28 = vcombine.low %v1134_v20, %v1138_v24  ;;  %v424_v17 = vcombine.high %v1134_v20, %v1138_v24 }
 0x876   :  { %v1150_v34 = vrot.slane %v423_v28, %v1145_v31 }
 0x877   :  { %v1142_v29 = vpop.permute.xlu1 %377  ;;  %v375_v30 = vpop.permute.xlu0 %374 }
 0x878   :  { %v439_v35 = vcombine.low %v1136_v23, %v1142_v29  ;;  %v471_v41 = vcombine.low %v1155_v38, %v1150_v34  ;;  %v472_v21 = vcombine.high %v1155_v38, %v1150_v34  ;;  %v440_v18 = vcombine.high %v1136_v23, %v1142_v29 }
 0x879   :  { %v438_v34 = vrot.slane %v424_v17, %v1145_v31  ;;  %v422_v38 = vrot.slane %v408_v8, %v1145_v31 }
 0x87a   :  { %v447_v42 = vrot.slane %v439_v35, %v1145_v31  ;;  %v479_v47 = vrot.slane %v471_v41, %v1158_v40  ;;  %v454_v35 = vrot.slane %v440_v18, %v1145_v31 }
 0x87b   :  { %v384_v36 = vpop.permute.xlu1 %383  ;;  %v381_v37 = vpop.permute.xlu0 %380 }
 0x87c   :  { %v455_v39 = vcombine.low %v375_v30, %v381_v37  ;;  %v456_v9 = vcombine.high %v375_v30, %v381_v37 }
 0x87e   :  { %v463_v43 = vrot.slane %v455_v39, %v1145_v31  ;;  %v470_v28 = vrot.slane %v456_v9, %v1145_v31 }
 0x87f   :  { %v390_v44 = vpop.permute.xlu1 %389  ;;  %v387_v45 = vpop.permute.xlu0 %386 }
 0x880   :  { %v503_v46 = vcombine.low %v447_v42, %v463_v43  ;;  %v543_v55 = vcombine.low %v384_v36, %v390_v44  ;;  %v504_v11 = vcombine.high %v447_v42, %v463_v43  ;;  %v544_v12 = vcombine.high %v384_v36, %v390_v44 }
 0x881   :  { %v486_v36 = vrot.slane %v472_v21, %v1158_v40  ;;  %v519_v39 = vcombine.low %v454_v35, %v470_v28 }
 0x882   :  { %v511_v48 = vrot.slane %v503_v46, %v1158_v40  ;;  %v551_v59 = vrot.slane %v543_v55, %v1145_v31  ;;  %v558_v30 = vrot.slane %v544_v12, %v1145_v31  ;;  %v518_v20 = vrot.slane %v504_v11, %v1158_v40 }
 0x883   :  { %v396_v49 = vpop.permute.xlu1 %395  ;;  %v393_v50 = vpop.permute.xlu0 %392  ;;  %v487_v46 = vcombine.low %v422_v38, %v438_v34 }
 0x884   :  { %v535_v51 = vcombine.low %v479_v47, %v511_v48  ;;  %v559_v2 = vcombine.low %v387_v45, %v393_v50  ;;  %v560_v1 = vcombine.high %v387_v45, %v393_v50  ;;  %v536_v32 = vcombine.high %v479_v47, %v511_v48 }
 0x885   :  { %v537_v41 = vcombine.low %v486_v36, %v518_v20  ;;  %v538_v48 = vcombine.high %v486_v36, %v518_v20 }
 0x886   :  { %v680_v52 = vsel %vm679_vm3, %v535_v51, -inf  ;;  %v567_v56 = vrot.slane %v559_v2, %v1145_v31  ;;  %v574_v19 = vrot.slane %v560_v1, %v1145_v31  ;;  %v686_v43 = vsel %vm679_vm3, %v536_v32, -inf }
 0x887   :  { %v402_v53 = vpop.permute.xlu1 %401  ;;  %681 = vmax.xlane.f32.xlu1 %v680_v52  ;;  %v399_v54 = vpop.permute.xlu0 %398  ;;  %v692_v51 = vsel %vm679_vm3, %v537_v41, -inf  ;;  %v495_v52 = vrot.slane %v487_v46, %v1158_v40 }
 0x888   :  { %v575_v57 = vcombine.low %v396_v49, %v402_v53  ;;  %v607_v61 = vcombine.low %v551_v59, %v567_v56  ;;  %v608_v3 = vcombine.high %v551_v59, %v567_v56  ;;  %v576_v4 = vcombine.high %v396_v49, %v402_v53 }
 0x889   :  { %v623_v37 = vcombine.low %v558_v30, %v574_v19  ;;  %v527_v49 = vrot.slane %v519_v39, %v1158_v40  ;;  %v624_v53 = vcombine.high %v558_v30, %v574_v19 }
 0x88a   :  { %v583_v62 = vrot.slane %v575_v57, %v1145_v31  ;;  %v615_v14 = vrot.slane %v607_v61, %v1158_v40  ;;  %v590_v22 = vrot.slane %v576_v4, %v1145_v31  ;;  %v622_v27 = vrot.slane %v608_v3, %v1158_v40 }
 0x88b   :  { %v405_v58 = vpop.permute.xlu0 %404  ;;  %v631_v47 = vrot.slane %v623_v37, %v1158_v40  ;;  %v539_v55 = vcombine.low %v495_v52, %v527_v49  ;;  %v698_v57 = vsel %vm679_vm3, %v538_v48, -inf  ;;  %v638_v61 = vrot.slane %v624_v53, %v1158_v40 }
 0x88c   :  { %v591_v60 = vcombine.low %v399_v54, %v405_v58  ;;  %v592_v63 = vcombine.high %v399_v54, %v405_v58  ;;  %v520_v54 = vcombine.high %v454_v35, %v470_v28  ;;  %v540_v3 = vcombine.high %v495_v52, %v527_v49 }
 0x88e   :  { %v599_v0 = vrot.slane %v591_v60, %v1145_v31  ;;  %v606_v13 = vrot.slane %v592_v63, %v1145_v31  ;;  %v488_v60 = vcombine.high %v422_v38, %v438_v34 }
 0x890   :  { %v639_v5 = vcombine.low %v583_v62, %v599_v0  ;;  %v640_v6 = vcombine.high %v583_v62, %v599_v0  ;;  %v655_v24 = vcombine.low %v590_v22, %v606_v13  ;;  %v656_v50 = vcombine.high %v590_v22, %v606_v13 }
 0x891   :  { %v534_v62 = vrot.slane %v520_v54, %v1158_v40  ;;  %v704_v0 = vsel %vm679_vm3, %v539_v55, -inf  ;;  %v502_v4 = vrot.slane %v488_v60, %v1158_v40 }
 0x892   :  { %v647_v15 = vrot.slane %v639_v5, %v1158_v40  ;;  %v654_v16 = vrot.slane %v640_v6, %v1158_v40  ;;  %v663_v45 = vrot.slane %v655_v24, %v1158_v40  ;;  %v670_v59 = vrot.slane %v656_v50, %v1158_v40 }
 0x893   :  { %v710_v6 = vsel %vm679_vm3, %v540_v3, -inf  ;;  %v541_v9 = vcombine.low %v502_v4, %v534_v62  ;;  %v542_v13 = vcombine.high %v502_v4, %v534_v62 }
 0x894   :  { %v672_v25 = vcombine.high %v615_v14, %v647_v15  ;;  %v671_v26 = vcombine.low %v615_v14, %v647_v15  ;;  %v673_v29 = vcombine.low %v622_v27, %v654_v16  ;;  %v674_v44 = vcombine.high %v622_v27, %v654_v16 }
 0x895   :  { %v675_v2 = vcombine.low %v631_v47, %v663_v45  ;;  %v676_v58 = vcombine.high %v631_v47, %v663_v45  ;;  %v677_v1 = vcombine.low %v638_v61, %v670_v59  ;;  %v678_v8 = vcombine.high %v638_v61, %v670_v59 }
 0x896   :  { %v689_v33 = vsel %vm679_vm3, %v672_v25, -inf  ;;  %v683_v23 = vsel %vm679_vm3, %v671_v26, -inf  ;;  %v695_v42 = vsel %vm679_vm3, %v673_v29, -inf  ;;  %v701_v31 = vsel %vm679_vm3, %v674_v44, -inf }
 0x897   :  { %690 = vmax.xlane.f32.xlu1 %v689_v33  ;;  %684 = vmax.xlane.f32.xlu0 %v683_v23  ;;  %v707_v56 = vsel %vm679_vm3, %v675_v2, -inf  ;;  %v713_v63 = vsel %vm679_vm3, %v676_v58, -inf  ;;  %v719_v5 = vsel %vm679_vm3, %v677_v1, -inf  ;;  %v725_v11 = vsel %vm679_vm3, %v678_v8, -inf }
 0x898   :  { %v716_v12 = vsel %vm679_vm3, %v541_v9, -inf  ;;  %v722_v14 = vsel %vm679_vm3, %v542_v13, -inf }
 0x89b   :  { %696 = vmax.xlane.f32.xlu1 %v695_v42  ;;  %687 = vmax.xlane.f32.xlu0 %v686_v43 }
 0x89f   :  { %702 = vmax.xlane.f32.xlu1 %v701_v31  ;;  %693 = vmax.xlane.f32.xlu0 %v692_v51 }
 0x8a3   :  { %708 = vmax.xlane.f32.xlu1 %v707_v56  ;;  %699 = vmax.xlane.f32.xlu0 %v698_v57 }
 0x8a7   :  { %714 = vmax.xlane.f32.xlu1 %v713_v63  ;;  %705 = vmax.xlane.f32.xlu0 %v704_v0 }
 0x8ab   :  { %720 = vmax.xlane.f32.xlu1 %v719_v5  ;;  %711 = vmax.xlane.f32.xlu0 %v710_v6 }
 0x8af   :  { %726 = vmax.xlane.f32.xlu1 %v725_v11  ;;  %717 = vmax.xlane.f32.xlu0 %v716_v12 }
 0x8b3   :  { %723 = vmax.xlane.f32.xlu0 %v722_v14 }
 0x914   :  { %v682_v15 = vpop.xlane.xlu1 %681 }
 0x915   :  { %v749_v17 = vrot.slane %v682_v15, %v1046_v7 }
 0x924   :  { %v691_v40 = vpop.xlane.xlu1 %690  ;;  %v685_v16 = vpop.xlane.xlu0 %684 }
 0x925   :  { %v754_v21 = vrot.slane %v685_v16, %v1049_v10  ;;  %v764_v25 = vrot.slane %v691_v40, %v1049_v10 }
 0x927   :  { %v756_v18 = vsel %vm755_vm4, %v754_v21, %v749_v17 }
 0x928   :  { %v697_v19 = vpop.xlane.xlu1 %696  ;;  %v688_v22 = vpop.xlane.xlu0 %687 }
 0x929   :  { %v760_v26 = vrot.slane %v688_v22, %v1046_v7  ;;  %v773_v20 = vrot.slane %v697_v19, %v1049_v10 }
 0x92b   :  { %v765_v27 = vsel %vm755_vm4, %v764_v25, %v760_v26 }
 0x92c   :  { %v821_v28 = vsel %vm820_vm5, %v765_v27, %v756_v18  ;;  %v703_v30 = vpop.xlane.xlu1 %702  ;;  %v694_v32 = vpop.xlane.xlu0 %693 }
 0x92d   :  { %v769_v24 = vrot.slane %v694_v32, %v1046_v7  ;;  %v782_v35 = vrot.slane %v703_v30, %v1049_v10 }
 0x92f   :  { %v774_v33 = vsel %vm755_vm4, %v773_v20, %v769_v24 }
 0x930   :  { %v823_v23 = vsel %vm822_vm6, %v774_v33, %v821_v28  ;;  %v709_v29 = vpop.xlane.xlu1 %708  ;;  %v700_v34 = vpop.xlane.xlu0 %699 }
 0x931   :  { %v778_v36 = vrot.slane %v700_v34, %v1046_v7  ;;  %v791_v42 = vrot.slane %v709_v29, %v1049_v10 }
 0x933   :  { %v783_v37 = vsel %vm755_vm4, %v782_v35, %v778_v36 }
 0x934   :  { %v825_v38 = vsel %vm824_vm7, %v783_v37, %v823_v23  ;;  %v715_v39 = vpop.xlane.xlu1 %714  ;;  %v706_v41 = vpop.xlane.xlu0 %705 }
 0x935   :  { %v787_v43 = vrot.slane %v706_v41, %v1046_v7  ;;  %v800_v48 = vrot.slane %v715_v39, %v1049_v10 }
 0x937   :  { %v792_v44 = vsel %vm755_vm4, %v791_v42, %v787_v43 }
 0x938   :  { %v827_v45 = vsel %vm826_vm8, %v792_v44, %v825_v38  ;;  %v721_v46 = vpop.xlane.xlu1 %720  ;;  %v712_v47 = vpop.xlane.xlu0 %711 }
 0x939   :  { %v796_v49 = vrot.slane %v712_v47, %v1046_v7  ;;  %v809_v2 = vrot.slane %v721_v46, %v1049_v10 }
 0x93b   :  { %v801_v50 = vsel %vm755_vm4, %v800_v48, %v796_v49 }
 0x93c   :  { %v718_v31 = vpop.xlane.xlu0 %717  ;;  %v829_v51 = vsel %vm828_vm9, %v801_v50, %v827_v45  ;;  %v727_v53 = vpop.xlane.xlu1 %726 }
 0x93d   :  { %v805_v52 = vrot.slane %v718_v31, %v1046_v7  ;;  %v818_v57 = vrot.slane %v727_v53, %v1049_v10 }
 0x93f   :  { %v810_v54 = vsel %vm755_vm4, %v809_v2, %v805_v52 }
 0x940   :  { %v724_v55 = vpop.xlane.xlu0 %723  ;;  %v831_v56 = vsel %vm830_vm10, %v810_v54, %v829_v51 }
 0x941   :  { %v814_v58 = vrot.slane %v724_v55, %v1046_v7 }
 0x943   :  { %v819_v59 = vsel %vm755_vm4, %v818_v57, %v814_v58 }
 0x944   :  { %v833_v60 = vsel %vm832_vm11, %v819_v59, %v831_v56 }
 0x945   :  { %836 = vst.msk [vmem:[#allocation2] sm:$0xff] %vm835_vm12, %v833_v60 }
 0x946   :  { %959 = shalt.err (!%p956_p4)
}
 0x947   :  { %s960_s30 = scalar_lea.hbm %s1258_s6, 128 }
 0x948   :  { %p961_p5 = scmp.ne.s32.totalorder %s1258_s6, %s960_s30  ;;  %p964_p6 = scmp.lt.u32.totalorder %s960_s30, %s1258_s6 }
 0x94a   :  { %p966_p7 = pnand %p964_p6, %p961_p5 }
 0x94c   :  { %969 = shalt.err (!%p966_p7)
}
 0x94d   :  { %846 = dma.vmem_to_hbm [thread:$0]  %s844_s1, 128, %s1258_s6, [#allocation3]  }
 0x94e   :  { %970 = dma.done.wait [#allocation3], 128  }
 0x94f   :  { %971 = vsyncadd [#allocation3], 4294967168 }
 0x950   :  { %850 = vsyncpa [#allocation3], 1 }

// kernel: tpu_custom_call.1
= control target key start
LH: loop header
LB: loop body
LE: loop exit
PB: predicated region body
PF: predicated region fallthrough
CT: control target
= control target key end

     0   :  { %s928_s23 = smov 97   ;;  %s929_s24 = smov 127   ;;  %s1172_s0 = inlined_call_operand.vmem [shape: f32[1,8,32], index: 0, kind: input, shape index: {}]   ;;  %s1173_s1 = inlined_call_operand.vmem [shape: f32[2,32], index: 1, kind: input, shape index: {}]   ;;  %s1174_s2 = inlined_call_operand.vmem [shape: f32[8,24], index: 2, kind: input, shape index: {}]   ;;  %s1175_s3 = inlined_call_operand.vmem [shape: f32[8,24], index: 3, kind: input, shape index: {}]   ;;  %s1176_s4 = inlined_call_operand.vmem [shape: f32[8,24], index: 4, kind: input, shape index: {}]   ;;  %s1177_s5 = inlined_call_operand.vmem [shape: f32[3,8,1], index: 5, kind: input, shape index: {}]   ;;  %s1178_s6 = inlined_call_operand.hbm [shape: f32[1,8,16], index: 6, kind: output, shape index: {}]  }
   0x1   :  { %v24_v0 = vld [vmem:[%s1172_s0] sm:$0xff] }
   0x2   :  { %29 = vrot.lane.b32.xlu0 %v24_v0, %s928_s23  ;;  %42 = vrot.lane.b32.xlu1 %v24_v0, %s929_s24 }
   0x3   :  { %11 = vsyncpa [#allocation3], 0  ;;  %v930_v1 = vmov 0.0|0.0   ;;  %vm931_vm0 = vmmov 0   ;;  %v932_v2 = vmov 0.0   ;;  %s933_s25 = smov 1   ;;  %v37_v5 = vlaneseq }
   0x4   :  { %867 = vmatprep.subr.bf16.mxu0 %v930_v1  ;;  %846 = vmatprep.mubr.msk.f32.mxu0 %vm931_vm0, %v932_v2  ;;  %s934_s26 = smov 31   ;;  %v935_v3 = vmov 0   ;;  %v27_v4 = vld [vmem:[%s1177_s5] sm:$0xff]  ;;  %vm35_vm1 = vcmask 7168   ;;  %vm48_vm2 = vcmask 252928   ;;  %vm60_vm3 = vcmask 195584  }
   0x5   :  { %902 = vset.pattern.permute.xlu0 %v935_v3  ;;  %870 = vmatprep.subr.bf16.mxu1 %v930_v1  ;;  %v1004_v6 = vshrl.u32 %v37_v5, 7  ;;  %v25_v8 = vld [vmem:[%s1173_s1] sm:$0x3]  ;;  %v824_v27 = vld [vmem:[%s1177_s5 + $0x8] sm:$0xff]  ;;  %v826_v43 = vld [vmem:[%s1177_s5 + $0x10] sm:$0xff]  ;;  %s936_s5 = smov 124  }
   0x6   :  { %32 = vrot.lane.b32.xlu0 %v24_v0, %s933_s25  ;;  %45 = vrot.lane.b32.xlu1 %v24_v0, %s934_s26  ;;  %v26_v21 = vld [vmem:[%s1174_s2] sm:$0xff]  ;;  %s937_s13 = smov 126   ;;  %s938_s14 = smov 120   ;;  %v951_v61 = vmov 1983009808   ;;  %vm651_vm4 = vcmask 15360  }
   0x7   :  { %855 = vmatprep.mubr.msk.f32.mxu1 %vm931_vm0, %v932_v2  ;;  %903 = vset.pattern.permute.xlu1 %v935_v3  ;;  %v39_v7 = vsub.s32 0, %v1004_v6  ;;  %v52_v13 = vsub.s32 1, %v1004_v6  ;;  %v135_v37 = vld [vmem:[%s1175_s3] sm:$0xff]  ;;  %s939_s15 = smov 122   ;;  %s941_s16 = smov 118   ;;  %v382_v62 = vunpack.c.l.s4 %v951_v61  ;;  %vm727_vm5 = vcmask 130112  }
   0x8   :  { %v234_v53 = vld [vmem:[%s1176_s4] sm:$0xff]  ;;  %s940_s4 = smov 116   ;;  %s942_s17 = smov 112   ;;  %vm792_vm6 = vcmask 1041409   ;;  %vm794_vm7 = vcmask 1042434   ;;  %vm796_vm8 = vcmask 1043459  }
   0x9   :  { %v40_v11 = vrot.slane %v25_v8, %v39_v7  ;;  %v53_v17 = vrot.slane %v25_v8, %v52_v13  ;;  %s943_s18 = smov 114   ;;  %s944_s19 = smov 108   ;;  %vm798_vm9 = vcmask 1044484   ;;  %vm800_vm10 = vcmask 1045509  }
   0xa   :  { %57 = vperm.xlu0 %902, %v27_v4   ;;  %s945_s20 = smov 110   ;;  %s946_s21 = smov 104   ;;  %vm802_vm11 = vcmask 1046534   ;;  %vm804_vm12 = vcmask 1047559   ;;  %vm807_vm13 = vcmask 130048  }
   0xb   :  { %s947_s22 = smov 106  }
  0x74   :  { %v30_v9 = vpop.permute.xlu0 %29  ;;  %v43_v10 = vpop.permute.xlu1 %42 }
  0x78   :  { %v33_v12 = vpop.permute.xlu0 %32  ;;  %v46_v16 = vpop.permute.xlu1 %45 }
  0x79   :  { %v36_v14 = vsel %vm35_vm1, %v30_v9, %v33_v12  ;;  %v49_v19 = vsel %vm48_vm2, %v43_v10, %v46_v16 }
  0x7a   :  { %v41_v15 = vmul.f32 %v40_v11, %v36_v14  ;;  %v54_v20 = vmul.f32 %v53_v17, %v49_v19 }
  0x7c   :  { %v868_v18 = vpack.c.bf16 %v24_v0, %v41_v15 }
  0x7e   :  { %869 = vmatpush3.bf16.msra.mxu0 %v868_v18 }
  0x7f   :  { %844 = vmatprep.subr.mxu0 %v932_v2 }
  0x82   :  { %845 = vmatpush3.msra.mxu0 %v54_v20 }
  0x83   :  { %847 = vmatmul.mubr.msk.f32.vlgmr.msra.gmra.mrb[0].mxu0 %vm60_vm3, %v26_v21  ;;  %873 = vmatprep.subr.bf16.mxu0 %v930_v1  ;;  %v383_v1 = vunpack.c.0.s8 %v382_v62 }
  0x84   :  { %864 = vmatprep.mubr.msk.f32.mxu0 %vm931_vm0, %v932_v2 }
  0x85   :  { %v1078_v9 = vsub.s32 %v383_v1, %v1004_v6 }
  0x89   :  { %v58_v22 = vpop.permute.xlu0 %57 }
 0x156   :  { %v130_v23 = vpop.f32.mrb[0].mxu0 }
 0x157   :  { %v131_v24 = vadd.f32 %v130_v23, %v58_v22  ;;  %v848_v25 = vpop.f32.mrb[1].mxu0 }
 0x159   :  { %v134_v26 = vmax.f32 %v131_v24, 0.0 }
 0x15b   :  { %147 = vrot.lane.b32.xlu0 %v134_v26, %s929_s24  ;;  %139 = vrot.lane.b32.xlu1 %v134_v26, %s928_s23 }
 0x15f   :  { %157 = vperm.xlu0 %902, %v824_v27   ;;  %142 = vrot.lane.b32.xlu1 %v134_v26, %s933_s25 }
 0x163   :  { %150 = vrot.lane.b32.xlu1 %v134_v26, %s934_s26 }
 0x1cd   :  { %v140_v28 = vpop.permute.xlu1 %139  ;;  %v148_v32 = vpop.permute.xlu0 %147 }
 0x1d1   :  { %v143_v29 = vpop.permute.xlu1 %142 }
 0x1d2   :  { %v145_v30 = vsel %vm35_vm1, %v140_v28, %v143_v29 }
 0x1d3   :  { %v146_v31 = vmul.f32 %v145_v30, %v40_v11 }
 0x1d5   :  { %v151_v33 = vpop.permute.xlu1 %150  ;;  %v871_v34 = vpack.c.bf16 %v134_v26, %v146_v31 }
 0x1d6   :  { %v153_v35 = vsel %vm48_vm2, %v148_v32, %v151_v33 }
 0x1d7   :  { %872 = vmatpush3.bf16.msra.mxu1 %v871_v34  ;;  %v154_v36 = vmul.f32 %v153_v35, %v53_v17 }
 0x1d8   :  { %853 = vmatprep.subr.mxu1 %v932_v2 }
 0x1db   :  { %854 = vmatpush3.msra.mxu1 %v154_v36 }
 0x1dc   :  { %856 = vmatmul.mubr.msk.f32.vlgmr.msra.gmra.mrb[0].mxu1 %vm60_vm3, %v135_v37 }
 0x1de   :  { %v158_v38 = vpop.permute.xlu0 %157 }
 0x2af   :  { %v229_v39 = vpop.f32.mrb[0].mxu1 }
 0x2b0   :  { %v230_v40 = vadd.f32 %v229_v39, %v158_v38  ;;  %v857_v41 = vpop.f32.mrb[1].mxu1 }
 0x2b2   :  { %v233_v42 = vmax.f32 %v230_v40, 0.0 }
 0x2b4   :  { %241 = vrot.lane.b32.xlu0 %v233_v42, %s933_s25  ;;  %238 = vrot.lane.b32.xlu1 %v233_v42, %s928_s23  ;;  %s948_s23 = smov 100   ;;  %s950_s25 = smov 98  }
 0x2b8   :  { %249 = vrot.lane.b32.xlu0 %v233_v42, %s934_s26  ;;  %246 = vrot.lane.b32.xlu1 %v233_v42, %s929_s24  ;;  %s949_s24 = smov 102   ;;  %s953_s26 = smov [#allocation2]  }
 0x2b9   :  { %s815_s0 = sshll.u32 %s953_s26, 4  ;;  %s816_s0 = int_to_ptr.vmem [resolvable:$true] %s815_s0 }
 0x2ba   :  { %s904_s27 = scalar_lea.vmem %s816_s0, 128  ;;  %p909_p1 = scmp.lt.s32.totalorder %s816_s0, %s816_s0 }
 0x2bb   :  { %p905_p0 = scmp.ne.s32.totalorder %s816_s0, %s904_s27  ;;  %p910_p2 = scmp.lt.s32.totalorder %s904_s27, %s904_s27 }
 0x2bc   :  { %256 = vperm.xlu1 %903, %v826_v43  }
 0x2bd   :  { %p911_p3 = por %p910_p2, %p909_p1 }
 0x2bf   :  { %p912_p4 = pnand %p911_p3, %p905_p0 }
 0x326   :  { %v242_v44 = vpop.permute.xlu0 %241  ;;  %v239_v45 = vpop.permute.xlu1 %238 }
 0x327   :  { %v244_v46 = vsel %vm35_vm1, %v239_v45, %v242_v44 }
 0x328   :  { %v245_v47 = vmul.f32 %v244_v46, %v40_v11 }
 0x32a   :  { %v874_v48 = vpack.c.bf16 %v233_v42, %v245_v47  ;;  %v250_v49 = vpop.permute.xlu0 %249  ;;  %v247_v50 = vpop.permute.xlu1 %246 }
 0x32b   :  { %v252_v51 = vsel %vm48_vm2, %v247_v50, %v250_v49 }
 0x32c   :  { %875 = vmatpush3.bf16.msra.mxu0 %v874_v48  ;;  %v253_v52 = vmul.f32 %v252_v51, %v53_v17 }
 0x32d   :  { %862 = vmatprep.subr.mxu0 %v932_v2  ;;  %v952_v2 = vmov 1934713408  }
 0x32e   :  { %v446_v3 = vunpack.c.l.s4 %v952_v2 }
 0x330   :  { %863 = vmatpush3.msra.mxu0 %v253_v52  ;;  %v447_v11 = vunpack.c.0.s8 %v446_v3 }
 0x331   :  { %865 = vmatmul.mubr.msk.f32.vlgmr.msra.gmra.mrb[2].mxu0 %vm60_vm3, %v234_v53 }
 0x332   :  { %v1091_v18 = vsub.s32 %v447_v11, %v1004_v6 }
 0x33b   :  { %v257_v54 = vpop.permute.xlu1 %256 }
 0x404   :  { %v328_v55 = vpop.f32.mrb[2].mxu0 }
 0x405   :  { %v329_v56 = vadd.f32 %v328_v55, %v257_v54  ;;  %v866_v57 = vpop.f32.mrb[3].mxu0 }
 0x407   :  { %v1048_v58 = vmax.f32 %v329_v56, 0.0 }
 0x409   :  { %337 = vrot.lane.b32.xlu1 %v1048_v58, %s936_s5  ;;  %334 = vrot.lane.b32.xlu0 %v1048_v58, %s937_s13 }
 0x40d   :  { %343 = vrot.lane.b32.xlu1 %v1048_v58, %s938_s14  ;;  %340 = vrot.lane.b32.xlu0 %v1048_v58, %s939_s15 }
 0x411   :  { %349 = vrot.lane.b32.xlu1 %v1048_v58, %s940_s4  ;;  %346 = vrot.lane.b32.xlu0 %v1048_v58, %s941_s16 }
 0x415   :  { %355 = vrot.lane.b32.xlu1 %v1048_v58, %s942_s17  ;;  %352 = vrot.lane.b32.xlu0 %v1048_v58, %s943_s18 }
 0x419   :  { %361 = vrot.lane.b32.xlu1 %v1048_v58, %s944_s19  ;;  %358 = vrot.lane.b32.xlu0 %v1048_v58, %s945_s20 }
 0x41d   :  { %367 = vrot.lane.b32.xlu1 %v1048_v58, %s946_s21  ;;  %364 = vrot.lane.b32.xlu0 %v1048_v58, %s947_s22 }
 0x421   :  { %373 = vrot.lane.b32.xlu1 %v1048_v58, %s948_s23  ;;  %370 = vrot.lane.b32.xlu0 %v1048_v58, %s949_s24 }
 0x425   :  { %376 = vrot.lane.b32.xlu0 %v1048_v58, %s950_s25 }
 0x47b   :  { %v1065_v59 = vpop.permute.xlu1 %337  ;;  %v1067_v60 = vpop.permute.xlu0 %334 }
 0x47c   :  { %v379_v10 = vcombine.low %v1048_v58, %v1065_v59  ;;  %v380_v49 = vcombine.high %v1048_v58, %v1065_v59 }
 0x47e   :  { %v1088_v16 = vrot.slane %v379_v10, %v1078_v9 }
 0x47f   :  { %v1069_v63 = vpop.permute.xlu1 %343  ;;  %v1071_v0 = vpop.permute.xlu0 %340 }
 0x480   :  { %v395_v4 = vcombine.low %v1067_v60, %v1071_v0  ;;  %v396_v57 = vcombine.high %v1067_v60, %v1071_v0 }
 0x482   :  { %v1083_v12 = vrot.slane %v395_v4, %v1078_v9 }
 0x483   :  { %v1075_v7 = vpop.permute.xlu1 %349  ;;  %v347_v8 = vpop.permute.xlu0 %346 }
 0x484   :  { %v411_v13 = vcombine.low %v1069_v63, %v1075_v7  ;;  %v443_v19 = vcombine.low %v1088_v16, %v1083_v12  ;;  %v444_v61 = vcombine.high %v1088_v16, %v1083_v12  ;;  %v412_v58 = vcombine.high %v1069_v63, %v1075_v7 }
 0x485   :  { %v410_v12 = vrot.slane %v396_v57, %v1078_v9  ;;  %v394_v16 = vrot.slane %v380_v49, %v1078_v9 }
 0x486   :  { %v419_v20 = vrot.slane %v411_v13, %v1078_v9  ;;  %v451_v25 = vrot.slane %v443_v19, %v1091_v18  ;;  %v426_v13 = vrot.slane %v412_v58, %v1078_v9 }
 0x487   :  { %v356_v14 = vpop.permute.xlu1 %355  ;;  %v353_v15 = vpop.permute.xlu0 %352 }
 0x488   :  { %v427_v17 = vcombine.low %v347_v8, %v353_v15  ;;  %v428_v50 = vcombine.high %v347_v8, %v353_v15 }
 0x48a   :  { %v435_v21 = vrot.slane %v427_v17, %v1078_v9  ;;  %v442_v4 = vrot.slane %v428_v50, %v1078_v9 }
 0x48b   :  { %v362_v22 = vpop.permute.xlu1 %361  ;;  %v359_v23 = vpop.permute.xlu0 %358 }
 0x48c   :  { %v475_v24 = vcombine.low %v419_v20, %v435_v21  ;;  %v515_v34 = vcombine.low %v356_v14, %v362_v22  ;;  %v476_v51 = vcombine.high %v419_v20, %v435_v21  ;;  %v516_v52 = vcombine.high %v356_v14, %v362_v22 }
 0x48d   :  { %v458_v14 = vrot.slane %v444_v61, %v1091_v18  ;;  %v491_v17 = vcombine.low %v426_v13, %v442_v4 }
 0x48e   :  { %v483_v26 = vrot.slane %v475_v24, %v1091_v18  ;;  %v523_v38 = vrot.slane %v515_v34, %v1078_v9  ;;  %v530_v8 = vrot.slane %v516_v52, %v1078_v9  ;;  %v490_v60 = vrot.slane %v476_v51, %v1091_v18 }
 0x48f   :  { %v368_v27 = vpop.permute.xlu1 %367  ;;  %v365_v28 = vpop.permute.xlu0 %364  ;;  %v459_v24 = vcombine.low %v394_v16, %v410_v12 }
 0x490   :  { %v507_v29 = vcombine.low %v451_v25, %v483_v26  ;;  %v531_v30 = vcombine.low %v359_v23, %v365_v28  ;;  %v532_v44 = vcombine.high %v359_v23, %v365_v28  ;;  %v508_v10 = vcombine.high %v451_v25, %v483_v26 }
 0x491   :  { %v509_v19 = vcombine.low %v458_v14, %v490_v60  ;;  %v510_v26 = vcombine.high %v458_v14, %v490_v60 }
 0x492   :  { %v652_v31 = vsel %vm651_vm4, %v507_v29, -inf  ;;  %v539_v35 = vrot.slane %v531_v30, %v1078_v9  ;;  %v546_v59 = vrot.slane %v532_v44, %v1078_v9  ;;  %v658_v21 = vsel %vm651_vm4, %v508_v10, -inf }
 0x493   :  { %v374_v32 = vpop.permute.xlu1 %373  ;;  %653 = vmax.xlane.f32.xlu1 %v652_v31  ;;  %v371_v33 = vpop.permute.xlu0 %370  ;;  %v664_v29 = vsel %vm651_vm4, %v509_v19, -inf  ;;  %v467_v31 = vrot.slane %v459_v24, %v1091_v18 }
 0x494   :  { %v547_v36 = vcombine.low %v368_v27, %v374_v32  ;;  %v579_v40 = vcombine.low %v523_v38, %v539_v35  ;;  %v580_v45 = vcombine.high %v523_v38, %v539_v35  ;;  %v548_v46 = vcombine.high %v368_v27, %v374_v32 }
 0x495   :  { %v595_v15 = vcombine.low %v530_v8, %v546_v59  ;;  %v499_v27 = vrot.slane %v491_v17, %v1091_v18  ;;  %v596_v32 = vcombine.high %v530_v8, %v546_v59 }
 0x496   :  { %v555_v41 = vrot.slane %v547_v36, %v1078_v9  ;;  %v587_v54 = vrot.slane %v579_v40, %v1091_v18  ;;  %v562_v62 = vrot.slane %v548_v46, %v1078_v9  ;;  %v594_v3 = vrot.slane %v580_v45, %v1091_v18 }
 0x497   :  { %v377_v37 = vpop.permute.xlu0 %376  ;;  %v603_v25 = vrot.slane %v595_v15, %v1091_v18  ;;  %v511_v34 = vcombine.low %v467_v31, %v499_v27  ;;  %v670_v36 = vsel %vm651_vm4, %v510_v26, -inf  ;;  %v610_v40 = vrot.slane %v596_v32, %v1091_v18 }
 0x498   :  { %v563_v39 = vcombine.low %v371_v33, %v377_v37  ;;  %v564_v42 = vcombine.high %v371_v33, %v377_v37  ;;  %v492_v33 = vcombine.high %v426_v13, %v442_v4  ;;  %v512_v45 = vcombine.high %v467_v31, %v499_v27 }
 0x49a   :  { %v571_v43 = vrot.slane %v563_v39, %v1078_v9  ;;  %v578_v53 = vrot.slane %v564_v42, %v1078_v9  ;;  %v460_v39 = vcombine.high %v394_v16, %v410_v12 }
 0x49c   :  { %v611_v47 = vcombine.low %v555_v41, %v571_v43  ;;  %v612_v48 = vcombine.high %v555_v41, %v571_v43  ;;  %v627_v0 = vcombine.low %v562_v62, %v578_v53  ;;  %v628_v28 = vcombine.high %v562_v62, %v578_v53 }
 0x49d   :  { %v506_v41 = vrot.slane %v492_v33, %v1091_v18  ;;  %v676_v43 = vsel %vm651_vm4, %v511_v34, -inf  ;;  %v474_v46 = vrot.slane %v460_v39, %v1091_v18  ;;  %v717_v62 = vand.u32 127, %v37_v5 }
 0x49e   :  { %v619_v55 = vrot.slane %v611_v47, %v1091_v18  ;;  %v626_v56 = vrot.slane %v612_v48, %v1091_v18  ;;  %v635_v23 = vrot.slane %v627_v0, %v1091_v18  ;;  %v642_v38 = vrot.slane %v628_v28, %v1091_v18 }
 0x49f   :  { %v682_v48 = vsel %vm651_vm4, %v512_v45, -inf  ;;  %v513_v50 = vcombine.low %v474_v46, %v506_v41  ;;  %v514_v53 = vcombine.high %v474_v46, %v506_v41  ;;  %v720_v10 = vsub.s32 %v717_v62, %v1004_v6 }
 0x4a0   :  { %v644_v1 = vcombine.high %v587_v54, %v619_v55  ;;  %v643_v2 = vcombine.low %v587_v54, %v619_v55  ;;  %v645_v7 = vcombine.low %v594_v3, %v626_v56  ;;  %v646_v22 = vcombine.high %v594_v3, %v626_v56 }
 0x4a1   :  { %v647_v30 = vcombine.low %v603_v25, %v635_v23  ;;  %v648_v37 = vcombine.high %v603_v25, %v635_v23  ;;  %v649_v44 = vcombine.low %v610_v40, %v642_v38  ;;  %v650_v49 = vcombine.high %v610_v40, %v642_v38 }
 0x4a2   :  { %v661_v11 = vsel %vm651_vm4, %v644_v1, -inf  ;;  %v655_v63 = vsel %vm651_vm4, %v643_v2, -inf  ;;  %v667_v20 = vsel %vm651_vm4, %v645_v7, -inf  ;;  %v673_v9 = vsel %vm651_vm4, %v646_v22, -inf }
 0x4a3   :  { %662 = vmax.xlane.f32.xlu1 %v661_v11  ;;  %656 = vmax.xlane.f32.xlu0 %v655_v63  ;;  %v679_v35 = vsel %vm651_vm4, %v647_v30, -inf  ;;  %v685_v42 = vsel %vm651_vm4, %v648_v37, -inf  ;;  %v691_v47 = vsel %vm651_vm4, %v649_v44, -inf  ;;  %v697_v51 = vsel %vm651_vm4, %v650_v49, -inf }
 0x4a4   :  { %v688_v52 = vsel %vm651_vm4, %v513_v50, -inf  ;;  %v694_v54 = vsel %vm651_vm4, %v514_v53, -inf  ;;  %v722_v3 = vadd.s32 4294967288, %v717_v62 }
 0x4a6   :  { %v725_v60 = vsub.s32 %v722_v3, %v1004_v6 }
 0x4a7   :  { %668 = vmax.xlane.f32.xlu1 %v667_v20  ;;  %659 = vmax.xlane.f32.xlu0 %v658_v21 }
 0x4ab   :  { %674 = vmax.xlane.f32.xlu1 %v673_v9  ;;  %665 = vmax.xlane.f32.xlu0 %v664_v29 }
 0x4af   :  { %680 = vmax.xlane.f32.xlu1 %v679_v35  ;;  %671 = vmax.xlane.f32.xlu0 %v670_v36 }
 0x4b3   :  { %686 = vmax.xlane.f32.xlu1 %v685_v42  ;;  %677 = vmax.xlane.f32.xlu0 %v676_v43 }
 0x4b7   :  { %692 = vmax.xlane.f32.xlu1 %v691_v47  ;;  %683 = vmax.xlane.f32.xlu0 %v682_v48 }
 0x4bb   :  { %698 = vmax.xlane.f32.xlu1 %v697_v51  ;;  %689 = vmax.xlane.f32.xlu0 %v688_v52 }
 0x4bf   :  { %695 = vmax.xlane.f32.xlu0 %v694_v54 }
 0x520   :  { %v654_v55 = vpop.xlane.xlu1 %653 }
 0x521   :  { %v721_v16 = vrot.slane %v654_v55, %v720_v10 }
 0x530   :  { %v663_v18 = vpop.xlane.xlu1 %662  ;;  %v657_v56 = vpop.xlane.xlu0 %656 }
 0x531   :  { %v736_v12 = vrot.slane %v663_v18, %v725_v60  ;;  %v726_v13 = vrot.slane %v657_v56, %v725_v60 }
 0x533   :  { %v728_v23 = vsel %vm727_vm5, %v726_v13, %v721_v16 }
 0x534   :  { %v669_v57 = vpop.xlane.xlu1 %668  ;;  %v660_v61 = vpop.xlane.xlu0 %659 }
 0x535   :  { %v732_v0 = vrot.slane %v660_v61, %v720_v10  ;;  %v745_v15 = vrot.slane %v669_v57, %v725_v60 }
 0x537   :  { %v737_v17 = vsel %vm727_vm5, %v736_v12, %v732_v0 }
 0x538   :  { %v675_v58 = vpop.xlane.xlu1 %674  ;;  %v666_v59 = vpop.xlane.xlu0 %665  ;;  %v793_v27 = vsel %vm792_vm6, %v737_v17, %v728_v23 }
 0x539   :  { %v741_v11 = vrot.slane %v666_v59, %v720_v10  ;;  %v754_v19 = vrot.slane %v675_v58, %v725_v60 }
 0x53b   :  { %v746_v21 = vsel %vm727_vm5, %v745_v15, %v741_v11 }
 0x53c   :  { %v681_v1 = vpop.xlane.xlu1 %680  ;;  %v672_v2 = vpop.xlane.xlu0 %671  ;;  %v795_v30 = vsel %vm794_vm7, %v746_v21, %v793_v27 }
 0x53d   :  { %v750_v14 = vrot.slane %v672_v2, %v720_v10  ;;  %v763_v6 = vrot.slane %v681_v1, %v725_v60 }
 0x53f   :  { %v755_v24 = vsel %vm727_vm5, %v754_v19, %v750_v14 }
 0x540   :  { %v687_v4 = vpop.xlane.xlu1 %686  ;;  %v678_v8 = vpop.xlane.xlu0 %677  ;;  %v797_v32 = vsel %vm796_vm8, %v755_v24, %v795_v30 }
 0x541   :  { %v759_v5 = vrot.slane %v678_v8, %v720_v10  ;;  %v772_v25 = vrot.slane %v687_v4, %v725_v60 }
 0x543   :  { %v764_v28 = vsel %vm727_vm5, %v763_v6, %v759_v5 }
 0x544   :  { %v693_v63 = vpop.xlane.xlu1 %692  ;;  %v684_v7 = vpop.xlane.xlu0 %683  ;;  %v799_v35 = vsel %vm798_vm9, %v764_v28, %v797_v32 }
 0x545   :  { %v768_v20 = vrot.slane %v684_v7, %v720_v10  ;;  %v781_v9 = vrot.slane %v693_v63, %v725_v60 }
 0x547   :  { %v773_v31 = vsel %vm727_vm5, %v772_v25, %v768_v20 }
 0x548   :  { %v690_v22 = vpop.xlane.xlu0 %689  ;;  %v699_v29 = vpop.xlane.xlu1 %698  ;;  %v801_v38 = vsel %vm800_vm10, %v773_v31, %v799_v35 }
 0x549   :  { %v777_v26 = vrot.slane %v690_v22, %v720_v10  ;;  %v790_v36 = vrot.slane %v699_v29, %v725_v60 }
 0x54b   :  { %v782_v33 = vsel %vm727_vm5, %v781_v9, %v777_v26 }
 0x54c   :  { %v696_v34 = vpop.xlane.xlu0 %695  ;;  %v803_v40 = vsel %vm802_vm11, %v782_v33, %v801_v38 }
 0x54d   :  { %v786_v37 = vrot.slane %v696_v34, %v720_v10 }
 0x54f   :  { %v791_v39 = vsel %vm727_vm5, %v790_v36, %v786_v37 }
 0x550   :  { %v805_v41 = vsel %vm804_vm12, %v791_v39, %v803_v40 }
 0x551   :  { %808 = vst.msk [vmem:[#allocation2] sm:$0xff] %vm807_vm13, %v805_v41 }
 0x552   :  { %915 = shalt.err (!%p912_p4)
}
 0x553   :  { %s916_s1 = scalar_lea.hbm %s1178_s6, 128 }
 0x554   :  { %p917_p5 = scmp.ne.s32.totalorder %s1178_s6, %s916_s1  ;;  %p920_p6 = scmp.lt.u32.totalorder %s916_s1, %s1178_s6 }
 0x556   :  { %p922_p7 = pnand %p920_p6, %p917_p5 }
 0x558   :  { %925 = shalt.err (!%p922_p7)
}
 0x559   :  { %818 = dma.vmem_to_hbm [thread:$0]  %s816_s0, 128, %s1178_s6, [#allocation3]  }
 0x55a   :  { %926 = dma.done.wait [#allocation3], 128  }
 0x55b   :  { %927 = vsyncadd [#allocation3], 4294967168 }
 0x55c   :  { %822 = vsyncpa [#allocation3], 1 }

// kernel: tpu_custom_call.1
= control target key start
LH: loop header
LB: loop body
LE: loop exit
PB: predicated region body
PF: predicated region fallthrough
CT: control target
= control target key end

     0   :  { %s437_s23 = smov 97   ;;  %s438_s24 = smov 127   ;;  %v439_v1 = vmov 0.0|0.0   ;;  %vm440_vm0 = vmmov 0   ;;  %v441_v2 = vmov 0.0   ;;  %v442_v3 = vmov 0   ;;  %s547_s0 = inlined_call_operand.vmem [shape: f32[1,8,32], index: 0, kind: input, shape index: {}]   ;;  %s548_s1 = inlined_call_operand.vmem [shape: f32[2,32], index: 1, kind: input, shape index: {}]   ;;  %s549_s2 = inlined_call_operand.vmem [shape: f32[8,24], index: 2, kind: input, shape index: {}]   ;;  %s550_s3 = inlined_call_operand.vmem [shape: f32[8,24], index: 3, kind: input, shape index: {}]   ;;  %s551_s4 = inlined_call_operand.vmem [shape: f32[8,24], index: 4, kind: input, shape index: {}]   ;;  %s552_s5 = inlined_call_operand.vmem [shape: f32[3,8,1], index: 5, kind: input, shape index: {}]   ;;  %s553_s6 = inlined_call_operand.hbm [shape: f32[1,8,32], index: 6, kind: output, shape index: {}]  }
   0x1   :  { %v24_v0 = vld [vmem:[%s547_s0] sm:$0xff]  ;;  %393 = vmatprep.subr.bf16.mxu0 %v439_v1  ;;  %372 = vmatprep.mubr.msk.f32.mxu0 %vm440_vm0, %v441_v2 }
   0x2   :  { %29 = vrot.lane.b32.xlu0 %v24_v0, %s437_s23  ;;  %42 = vrot.lane.b32.xlu1 %v24_v0, %s438_s24 }
   0x3   :  { %411 = vset.pattern.permute.xlu0 %v442_v3  ;;  %396 = vmatprep.subr.bf16.mxu1 %v439_v1 }
   0x4   :  { %11 = vsyncpa [#allocation3], 0  ;;  %381 = vmatprep.mubr.msk.f32.mxu1 %vm440_vm0, %v441_v2  ;;  %412 = vset.pattern.permute.xlu1 %v442_v3  ;;  %s443_s0 = smov 1   ;;  %s444_s25 = smov 31   ;;  %v27_v4 = vld [vmem:[%s552_s5] sm:$0xff]  ;;  %v37_v5 = vlaneseq  ;;  %vm35_vm1 = vcmask 7168  }
   0x5   :  { %v25_v8 = vld [vmem:[%s548_s1] sm:$0x3]  ;;  %vm48_vm2 = vcmask 252928   ;;  %vm60_vm3 = vcmask 195584   ;;  %v350_v27 = vld [vmem:[%s552_s5 + $0x8] sm:$0xff]  ;;  %v352_v43 = vld [vmem:[%s552_s5 + $0x10] sm:$0xff] }
   0x6   :  { %32 = vrot.lane.b32.xlu0 %v24_v0, %s443_s0  ;;  %45 = vrot.lane.b32.xlu1 %v24_v0, %s444_s25  ;;  %v38_v6 = vshrl.u32 %v37_v5, 7  ;;  %v26_v21 = vld [vmem:[%s549_s2] sm:$0xff]  ;;  %s445_s5 = smov [#allocation2]   ;;  %vm333_vm4 = vcmask 261120  }
   0x7   :  { %v135_v37 = vld [vmem:[%s550_s3] sm:$0xff]  ;;  %s341_s13 = sshll.u32 %s445_s5, 4  ;;  %s342_s13 = int_to_ptr.vmem [resolvable:$true] %s341_s13 }
   0x8   :  { %v39_v7 = vsub.s32 0, %v38_v6  ;;  %v52_v13 = vsub.s32 1, %v38_v6  ;;  %v234_v53 = vld [vmem:[%s551_s4] sm:$0xff]  ;;  %s413_s14 = scalar_lea.vmem %s342_s13, 128  ;;  %p418_p1 = scmp.lt.s32.totalorder %s342_s13, %s342_s13 }
   0x9   :  { %p414_p0 = scmp.ne.s32.totalorder %s342_s13, %s413_s14  ;;  %p419_p2 = scmp.lt.s32.totalorder %s413_s14, %s413_s14 }
   0xa   :  { %57 = vperm.xlu0 %411, %v27_v4   ;;  %v40_v11 = vrot.slane %v25_v8, %v39_v7  ;;  %v53_v17 = vrot.slane %v25_v8, %v52_v13 }
   0xb   :  { %p420_p3 = por %p419_p2, %p418_p1 }
   0xd   :  { %p421_p4 = pnand %p420_p3, %p414_p0 }
  0x74   :  { %v30_v9 = vpop.permute.xlu0 %29  ;;  %v43_v10 = vpop.permute.xlu1 %42 }
  0x78   :  { %v33_v12 = vpop.permute.xlu0 %32  ;;  %v46_v16 = vpop.permute.xlu1 %45 }
  0x79   :  { %v36_v14 = vsel %vm35_vm1, %v30_v9, %v33_v12  ;;  %v49_v19 = vsel %vm48_vm2, %v43_v10, %v46_v16 }
  0x7a   :  { %v41_v15 = vmul.f32 %v40_v11, %v36_v14  ;;  %v54_v20 = vmul.f32 %v53_v17, %v49_v19 }
  0x7c   :  { %v394_v18 = vpack.c.bf16 %v24_v0, %v41_v15 }
  0x7e   :  { %395 = vmatpush3.bf16.msra.mxu0 %v394_v18 }
  0x7f   :  { %370 = vmatprep.subr.mxu0 %v441_v2 }
  0x82   :  { %371 = vmatpush3.msra.mxu0 %v54_v20 }
  0x83   :  { %373 = vmatmul.mubr.msk.f32.vlgmr.msra.gmra.mrb[0].mxu0 %vm60_vm3, %v26_v21  ;;  %399 = vmatprep.subr.bf16.mxu0 %v439_v1 }
  0x84   :  { %390 = vmatprep.mubr.msk.f32.mxu0 %vm440_vm0, %v441_v2 }
  0x89   :  { %v58_v22 = vpop.permute.xlu0 %57 }
 0x156   :  { %v130_v23 = vpop.f32.mrb[0].mxu0 }
 0x157   :  { %v131_v24 = vadd.f32 %v130_v23, %v58_v22  ;;  %v374_v25 = vpop.f32.mrb[1].mxu0 }
 0x159   :  { %v134_v26 = vmax.f32 %v131_v24, 0.0 }
 0x15b   :  { %147 = vrot.lane.b32.xlu0 %v134_v26, %s438_s24  ;;  %139 = vrot.lane.b32.xlu1 %v134_v26, %s437_s23 }
 0x15f   :  { %157 = vperm.xlu0 %411, %v350_v27   ;;  %142 = vrot.lane.b32.xlu1 %v134_v26, %s443_s0 }
 0x163   :  { %150 = vrot.lane.b32.xlu1 %v134_v26, %s444_s25 }
 0x1cd   :  { %v140_v28 = vpop.permute.xlu1 %139  ;;  %v148_v32 = vpop.permute.xlu0 %147 }
 0x1d1   :  { %v143_v29 = vpop.permute.xlu1 %142 }
 0x1d2   :  { %v145_v30 = vsel %vm35_vm1, %v140_v28, %v143_v29 }
 0x1d3   :  { %v146_v31 = vmul.f32 %v145_v30, %v40_v11 }
 0x1d5   :  { %v151_v33 = vpop.permute.xlu1 %150  ;;  %v397_v34 = vpack.c.bf16 %v134_v26, %v146_v31 }
 0x1d6   :  { %v153_v35 = vsel %vm48_vm2, %v148_v32, %v151_v33 }
 0x1d7   :  { %398 = vmatpush3.bf16.msra.mxu1 %v397_v34  ;;  %v154_v36 = vmul.f32 %v153_v35, %v53_v17 }
 0x1d8   :  { %379 = vmatprep.subr.mxu1 %v441_v2 }
 0x1db   :  { %380 = vmatpush3.msra.mxu1 %v154_v36 }
 0x1dc   :  { %382 = vmatmul.mubr.msk.f32.vlgmr.msra.gmra.mrb[0].mxu1 %vm60_vm3, %v135_v37 }
 0x1de   :  { %v158_v38 = vpop.permute.xlu0 %157 }
 0x2af   :  { %v229_v39 = vpop.f32.mrb[0].mxu1 }
 0x2b0   :  { %v230_v40 = vadd.f32 %v229_v39, %v158_v38  ;;  %v383_v41 = vpop.f32.mrb[1].mxu1 }
 0x2b2   :  { %v233_v42 = vmax.f32 %v230_v40, 0.0 }
 0x2b4   :  { %241 = vrot.lane.b32.xlu0 %v233_v42, %s443_s0  ;;  %238 = vrot.lane.b32.xlu1 %v233_v42, %s437_s23 }
 0x2b8   :  { %249 = vrot.lane.b32.xlu0 %v233_v42, %s444_s25  ;;  %246 = vrot.lane.b32.xlu1 %v233_v42, %s438_s24 }
 0x2bc   :  { %256 = vperm.xlu1 %412, %v352_v43  }
 0x326   :  { %v242_v44 = vpop.permute.xlu0 %241  ;;  %v239_v45 = vpop.permute.xlu1 %238 }
 0x327   :  { %v244_v46 = vsel %vm35_vm1, %v239_v45, %v242_v44 }
 0x328   :  { %v245_v47 = vmul.f32 %v244_v46, %v40_v11 }
 0x32a   :  { %v400_v48 = vpack.c.bf16 %v233_v42, %v245_v47  ;;  %v250_v49 = vpop.permute.xlu0 %249  ;;  %v247_v50 = vpop.permute.xlu1 %246 }
 0x32b   :  { %v252_v51 = vsel %vm48_vm2, %v247_v50, %v250_v49 }
 0x32c   :  { %401 = vmatpush3.bf16.msra.mxu0 %v400_v48  ;;  %v253_v52 = vmul.f32 %v252_v51, %v53_v17 }
 0x32d   :  { %388 = vmatprep.subr.mxu0 %v441_v2 }
 0x330   :  { %389 = vmatpush3.msra.mxu0 %v253_v52 }
 0x331   :  { %391 = vmatmul.mubr.msk.f32.vlgmr.msra.gmra.mrb[2].mxu0 %vm60_vm3, %v234_v53 }
 0x33b   :  { %v257_v54 = vpop.permute.xlu1 %256 }
 0x404   :  { %v328_v55 = vpop.f32.mrb[2].mxu0 }
 0x405   :  { %v392_v56 = vpop.f32.mrb[3].mxu0  ;;  %v329_v57 = vadd.f32 %v328_v55, %v257_v54 }
 0x407   :  { %v332_v58 = vmax.f32 %v329_v57, 0.0 }
 0x409   :  { %334 = vst.msk [vmem:[#allocation2] sm:$0xff] %vm333_vm4, %v332_v58 }
 0x40a   :  { %424 = shalt.err (!%p421_p4)
}
 0x40b   :  { %s425_s16 = scalar_lea.hbm %s553_s6, 128 }
 0x40c   :  { %p426_p5 = scmp.ne.s32.totalorder %s553_s6, %s425_s16  ;;  %p429_p6 = scmp.lt.u32.totalorder %s425_s16, %s553_s6 }
 0x40e   :  { %p431_p7 = pnand %p429_p6, %p426_p5 }
 0x410   :  { %434 = shalt.err (!%p431_p7)
}
 0x411   :  { %344 = dma.vmem_to_hbm [thread:$0]  %s342_s13, 128, %s553_s6, [#allocation3]  }
 0x412   :  { %435 = dma.done.wait [#allocation3], 128  }
 0x413   :  { %436 = vsyncadd [#allocation3], 4294967168 }
 0x414   :  { %348 = vsyncpa [#allocation3], 1 }

</bundles_post_ra>
